<compile_context>
chip_gen: v5e
topology: v5e:2x2
jax: 0.10.0
libtpu: 0.0.40
codegen_flags: <defaults>
</compile_context>

<pallas_src>
import functools

import jax
import jax.numpy as jnp
from jax import lax
from jax.experimental import pallas as pl
from jax.experimental.pallas import tpu as pltpu


# ---------- counter-based PRNG (pure jnp ops: interpret-mode + TPU safe) ----------
_GOLD = 0x9E3779B9      # per-draw key stride
_ROW_MUL = 0x85EBCA6B   # row-index mixing constant
_COL_MUL = 0xC2B2AE35   # column-index mixing constant
_MIX1 = 0x7FEB352D      # lowbias32 constants
_MIX2 = 0x846CA68B


def _mix32(x):
    """lowbias32 avalanche hash on uint32 values."""
    x = x ^ (x >> 16)
    x = x * jnp.uint32(_MIX1)
    x = x ^ (x >> 15)
    x = x * jnp.uint32(_MIX2)
    x = x ^ (x >> 16)
    return x


def _uniform_from_bits(bits):
    """uint32 bits -> float32 uniform in [0, 1) via the mantissa trick (no int->float convert)."""
    fbits = (bits >> 9) | jnp.uint32(0x3F800000)
    return lax.bitcast_convert_type(fbits, jnp.float32) - jnp.float32(1.0)


def _hash_base(shape, row_offset_u32):
    """Per-element base value encoding (global batch row, unit index)."""
    rows = lax.broadcasted_iota(jnp.uint32, shape, 0) + row_offset_u32
    cols = lax.broadcasted_iota(jnp.uint32, shape, 1)
    return rows * jnp.uint32(_ROW_MUL) + cols * jnp.uint32(_COL_MUL)


def _rbm_kernel(n_gibbs, seed_ref, v_ref, w_ref, bh_ref, bv_ref, vout_ref):
    # TODO(synk): torch.rand()'s exact stream is not reproducible; sampling uses
    # a counter-based hash PRNG with identical Bernoulli semantics (1.0 iff p > u).
    TB, Vp = vout_ref.shape
    Hp = w_ref.shape[0]

    w = w_ref[...]                                   # [Hp, Vp] bf16, resident across the chain
    bh = jnp.broadcast_to(bh_ref[...], (TB, Hp))     # hoisted bias broadcasts
    bv = jnp.broadcast_to(bv_ref[...], (TB, Vp))

    row0 = (pl.program_id(0) * TB).astype(jnp.uint32)
    base_h = _hash_base((TB, Hp), row0)              # hoisted out of the Gibbs loop
    base_v = _hash_base((TB, Vp), row0)
    seed_u = seed_ref[0].astype(jnp.uint32)

    def _key(ctr):
        return seed_u + jnp.uint32((ctr * _GOLD) & 0xFFFFFFFF)

    def _sample(p, base, ctr):
        u = _uniform_from_bits(_mix32(base ^ _key(ctr)))
        return (p > u).astype(jnp.bfloat16)          # binary sample, exact in bf16

    def v_to_h(v_bf16, ctr):
        # v [TB, Vp] . W [Hp, Vp] contracted over V: no materialized W.T
        pre = lax.dot_general(v_bf16, w, (((1,), (1,)), ((), ())),
                              preferred_element_type=jnp.float32)
        return _sample(jax.nn.sigmoid(pre + bh), base_h, ctr)

    def h_to_v(h_bf16, ctr):
        pre = jnp.dot(h_bf16, w, preferred_element_type=jnp.float32)
        return _sample(jax.nn.sigmoid(pre + bv), base_v, ctr)

    v_ = v_ref[...]                                  # bf16 visible tile
    h = v_to_h(v_, 0)
    # Unrolled: n_gibbs is a small compile-time constant (default 5).
    for r in range(n_gibbs):
        v_ = h_to_v(h, 2 * r + 1)
        h = v_to_h(v_, 2 * r + 2)

    vout_ref[...] = v_.astype(jnp.float32)


def _round_up(x, m):
    return (x + m - 1) // m * m


def rbm_forward(visible, W, bias_visible, bias_hidden, *, kernel=5, seed=0):
    """Mirrors RBM.forward: returns (visible, v_) where v_ is the last visible sample."""
    B, V = visible.shape
    H = W.shape[0]

    # Lane-/sublane-dense padded shapes (zero padding is semantics-preserving).
    Vp = _round_up(V, 128)
    Hp = _round_up(H, 128)
    TB = 256 if B >= 256 else _round_up(B, 8)        # batch tile (fills the MXU at scale)
    Bp = _round_up(B, TB)

    v_p = jnp.zeros((Bp, Vp), jnp.bfloat16).at[:B, :V].set(visible.astype(jnp.bfloat16))
    w_p = jnp.zeros((Hp, Vp), jnp.bfloat16).at[:H, :V].set(W.astype(jnp.bfloat16))
    bh_p = jnp.zeros((1, Hp), jnp.float32).at[0, :H].set(bias_hidden.astype(jnp.float32))
    bv_p = jnp.zeros((1, Vp), jnp.float32).at[0, :V].set(bias_visible.astype(jnp.float32))
    seed_arr = jnp.asarray([seed], dtype=jnp.int32)

    kern = functools.partial(_rbm_kernel, kernel)

    v_out = pl.pallas_call(
        kern,
        out_shape=jax.ShapeDtypeStruct((Bp, Vp), jnp.float32),
        grid_spec=pltpu.PrefetchScalarGridSpec(
            num_scalar_prefetch=1,                   # seed lands in SMEM
            grid=(Bp // TB,),
            in_specs=[
                pl.BlockSpec((TB, Vp), lambda i, seed: (i, 0)),   # visible tile
                pl.BlockSpec((Hp, Vp), lambda i, seed: (0, 0)),   # W (resident)
                pl.BlockSpec((1, Hp), lambda i, seed: (0, 0)),    # bias_hidden
                pl.BlockSpec((1, Vp), lambda i, seed: (0, 0)),    # bias_visible
            ],
            out_specs=pl.BlockSpec((TB, Vp), lambda i, seed: (i, 0)),
        ),
        compiler_params=pltpu.CompilerParams(
            dimension_semantics=("parallel",)),
    )(seed_arr, v_p, w_p, bh_p, bv_p)

    return visible, v_out[:B, :V]


if __name__ == "__main__":
    # Small shapes consistent with the module (n_visible=784, n_hidden=500 scaled down).
    B, V, H = 8, 256, 128
    key = jax.random.PRNGKey(0)
    k_w, k_v = jax.random.split(key)

    # Deterministic parameter init matching __init__: W ~ N(0,1)*0.01, biases = 0.
    W = jax.random.normal(k_w, (H, V), dtype=jnp.float32) * 0.01
    bias_visible = jnp.zeros((V,), jnp.float32)
    bias_hidden = jnp.zeros((H,), jnp.float32)

    # Binary visible input (typical RBM usage).
    visible = (jax.random.uniform(k_v, (B, V)) > 0.5).astype(jnp.float32)

    v_in, v_out = rbm_forward(visible, W, bias_visible, bias_hidden, kernel=5, seed=0)
    jax.block_until_ready(v_out)

    assert v_in.shape == (B, V) and v_out.shape == (B, V)
    assert v_out.dtype == jnp.float32
    # Samples must be binary {0, 1}.
    assert bool(jnp.all((v_out == 0.0) | (v_out == 1.0)))

    print("KERNEL_OK")
</pallas_src>

<mosaic_0001>
module attributes {stable_mosaic.version = 11 : i64} {
  func.func @_rbm_kernel(%arg0: i32, %arg1: memref<1xi32, #tpu.memory_space<smem>>, %arg2: memref<8x256xbf16, #tpu.memory_space<vmem>>, %arg3: memref<128x256xbf16, #tpu.memory_space<vmem>>, %arg4: memref<1x128xf32, #tpu.memory_space<vmem>>, %arg5: memref<1x256xf32, #tpu.memory_space<vmem>>, %arg6: memref<8x256xf32, #tpu.memory_space<vmem>>) attributes {dimension_semantics = [#tpu.dimension_semantics<parallel>], iteration_bounds = array<i64: 1>, scalar_prefetch = 1 : i64, scratch_operands = 0 : i64, tpu.core_type = #tpu.core_type<tc>, window_params = [{transform_indices = @transform_0, window_bounds = array<i64: 8, 256>}, {pipeline_mode = #tpu.pipeline_mode<synchronous>, transform_indices = @transform_1, window_bounds = array<i64: 128, 256>}, {pipeline_mode = #tpu.pipeline_mode<synchronous>, transform_indices = @transform_2, window_bounds = array<i64: 1, 128>}, {pipeline_mode = #tpu.pipeline_mode<synchronous>, transform_indices = @transform_3, window_bounds = array<i64: 1, 256>}, {transform_indices = @transform_4, window_bounds = array<i64: 8, 256>}]} {
    %c0 = arith.constant 0 : index
    %c0_0 = arith.constant 0 : index
    %0 = vector.load %arg3[%c0, %c0_0] : memref<128x256xbf16, #tpu.memory_space<vmem>>, vector<128x256xbf16>
    %c0_1 = arith.constant 0 : index
    %c0_2 = arith.constant 0 : index
    %1 = vector.load %arg4[%c0_1, %c0_2] : memref<1x128xf32, #tpu.memory_space<vmem>>, vector<1x128xf32>
    %2 = vector.shape_cast %1 : vector<1x128xf32> to vector<1x128xf32>
    %3 = vector.broadcast %2 : vector<1x128xf32> to vector<8x128xf32>
    %c0_3 = arith.constant 0 : index
    %c0_4 = arith.constant 0 : index
    %4 = vector.load %arg5[%c0_3, %c0_4] : memref<1x256xf32, #tpu.memory_space<vmem>>, vector<1x256xf32>
    %5 = vector.shape_cast %4 : vector<1x256xf32> to vector<1x256xf32>
    %6 = vector.broadcast %5 : vector<1x256xf32> to vector<8x256xf32>
    %c8_i32 = arith.constant 8 : i32
    %7 = arith.muli %arg0, %c8_i32 : i32
    %8 = tpu.iota {dimensions = array<i32: 0>} : vector<8x128xi32>
    %9 = vector.broadcast %7 : i32 to vector<8x128xi32>
    %10 = arith.addi %8, %9 : vector<8x128xi32>
    %11 = tpu.iota {dimensions = array<i32: 1>} : vector<8x128xi32>
    %c-2048144789_i32 = arith.constant -2048144789 : i32
    %12 = vector.broadcast %c-2048144789_i32 : i32 to vector<8x128xi32>
    %13 = arith.muli %10, %12 : vector<8x128xi32>
    %c-1028477387_i32 = arith.constant -1028477387 : i32
    %14 = vector.broadcast %c-1028477387_i32 : i32 to vector<8x128xi32>
    %15 = arith.muli %11, %14 : vector<8x128xi32>
    %16 = arith.addi %13, %15 : vector<8x128xi32>
    %17 = tpu.iota {dimensions = array<i32: 0>} : vector<8x256xi32>
    %18 = vector.broadcast %7 : i32 to vector<8x256xi32>
    %19 = arith.addi %17, %18 : vector<8x256xi32>
    %20 = tpu.iota {dimensions = array<i32: 1>} : vector<8x256xi32>
    %c-2048144789_i32_5 = arith.constant -2048144789 : i32
    %21 = vector.broadcast %c-2048144789_i32_5 : i32 to vector<8x256xi32>
    %22 = arith.muli %19, %21 : vector<8x256xi32>
    %c-1028477387_i32_6 = arith.constant -1028477387 : i32
    %23 = vector.broadcast %c-1028477387_i32_6 : i32 to vector<8x256xi32>
    %24 = arith.muli %20, %23 : vector<8x256xi32>
    %25 = arith.addi %22, %24 : vector<8x256xi32>
    %c0_7 = arith.constant 0 : index
    %26 = memref.load %arg1[%c0_7] : memref<1xi32, #tpu.memory_space<smem>>
    %c0_8 = arith.constant 0 : index
    %c0_9 = arith.constant 0 : index
    %27 = vector.load %arg2[%c0_8, %c0_9] : memref<8x256xbf16, #tpu.memory_space<vmem>>, vector<8x256xbf16>
    %cst = arith.constant dense<0.000000e+00> : vector<8x128xf32>
    %28 = tpu.matmul %27, %0, %cst {dimension_numbers = #tpu.dot_dimension_numbers<[1], [1], [0], [0], [0, 0, 1, 0], [], []>} : vector<8x256xbf16>, vector<128x256xbf16>, vector<8x128xf32> -> vector<8x128xf32>
    %29 = arith.addf %28, %3 : vector<8x128xf32>
    %30 = arith.negf %29 : vector<8x128xf32>
    %31 = math.exp %30 : vector<8x128xf32>
    %cst_10 = arith.constant 1.000000e+00 : f32
    %32 = vector.broadcast %cst_10 : f32 to vector<8x128xf32>
    %33 = arith.addf %32, %31 : vector<8x128xf32>
    %34 = arith.divf %32, %33 : vector<8x128xf32>
    %c0_i32 = arith.constant 0 : i32
    %35 = arith.addi %26, %c0_i32 : i32
    %36 = vector.broadcast %35 : i32 to vector<8x128xi32>
    %37 = arith.xori %16, %36 : vector<8x128xi32>
    %c16_i32 = arith.constant 16 : i32
    %38 = vector.broadcast %c16_i32 : i32 to vector<8x128xi32>
    %39 = arith.shrui %37, %38 : vector<8x128xi32>
    %40 = arith.xori %37, %39 : vector<8x128xi32>
    %c2146121005_i32 = arith.constant 2146121005 : i32
    %41 = vector.broadcast %c2146121005_i32 : i32 to vector<8x128xi32>
    %42 = arith.muli %40, %41 : vector<8x128xi32>
    %c15_i32 = arith.constant 15 : i32
    %43 = vector.broadcast %c15_i32 : i32 to vector<8x128xi32>
    %44 = arith.shrui %42, %43 : vector<8x128xi32>
    %45 = arith.xori %42, %44 : vector<8x128xi32>
    %c-2073254261_i32 = arith.constant -2073254261 : i32
    %46 = vector.broadcast %c-2073254261_i32 : i32 to vector<8x128xi32>
    %47 = arith.muli %45, %46 : vector<8x128xi32>
    %c16_i32_11 = arith.constant 16 : i32
    %48 = vector.broadcast %c16_i32_11 : i32 to vector<8x128xi32>
    %49 = arith.shrui %47, %48 : vector<8x128xi32>
    %50 = arith.xori %47, %49 : vector<8x128xi32>
    %c9_i32 = arith.constant 9 : i32
    %51 = vector.broadcast %c9_i32 : i32 to vector<8x128xi32>
    %52 = arith.shrui %50, %51 : vector<8x128xi32>
    %c1065353216_i32 = arith.constant 1065353216 : i32
    %53 = vector.broadcast %c1065353216_i32 : i32 to vector<8x128xi32>
    %54 = arith.ori %52, %53 : vector<8x128xi32>
    %55 = tpu.bitcast %54 : vector<8x128xi32> -> vector<8x128xf32>
    %cst_12 = arith.constant 1.000000e+00 : f32
    %56 = vector.broadcast %cst_12 : f32 to vector<8x128xf32>
    %57 = arith.subf %55, %56 : vector<8x128xf32>
    %58 = arith.cmpf ogt, %34, %57 : vector<8x128xf32>
    %59 = arith.extui %58 : vector<8x128xi1> to vector<8x128xi32>
    %60 = arith.sitofp %59 : vector<8x128xi32> to vector<8x128xf32>
    %61 = arith.truncf %60 : vector<8x128xf32> to vector<8x128xbf16>
    %cst_13 = arith.constant dense<0.000000e+00> : vector<8x256xf32>
    %62 = tpu.matmul %61, %0, %cst_13 {dimension_numbers = #tpu.dot_dimension_numbers<[1], [0], [0], [1], [0, 0, 1, 1], [], []>} : vector<8x128xbf16>, vector<128x256xbf16>, vector<8x256xf32> -> vector<8x256xf32>
    %63 = arith.addf %62, %6 : vector<8x256xf32>
    %64 = arith.negf %63 : vector<8x256xf32>
    %65 = math.exp %64 : vector<8x256xf32>
    %cst_14 = arith.constant 1.000000e+00 : f32
    %66 = vector.broadcast %cst_14 : f32 to vector<8x256xf32>
    %67 = arith.addf %66, %65 : vector<8x256xf32>
    %68 = arith.divf %66, %67 : vector<8x256xf32>
    %c-1640531527_i32 = arith.constant -1640531527 : i32
    %69 = arith.addi %26, %c-1640531527_i32 : i32
    %70 = vector.broadcast %69 : i32 to vector<8x256xi32>
    %71 = arith.xori %25, %70 : vector<8x256xi32>
    %c16_i32_15 = arith.constant 16 : i32
    %72 = vector.broadcast %c16_i32_15 : i32 to vector<8x256xi32>
    %73 = arith.shrui %71, %72 : vector<8x256xi32>
    %74 = arith.xori %71, %73 : vector<8x256xi32>
    %c2146121005_i32_16 = arith.constant 2146121005 : i32
    %75 = vector.broadcast %c2146121005_i32_16 : i32 to vector<8x256xi32>
    %76 = arith.muli %74, %75 : vector<8x256xi32>
    %c15_i32_17 = arith.constant 15 : i32
    %77 = vector.broadcast %c15_i32_17 : i32 to vector<8x256xi32>
    %78 = arith.shrui %76, %77 : vector<8x256xi32>
    %79 = arith.xori %76, %78 : vector<8x256xi32>
    %c-2073254261_i32_18 = arith.constant -2073254261 : i32
    %80 = vector.broadcast %c-2073254261_i32_18 : i32 to vector<8x256xi32>
    %81 = arith.muli %79, %80 : vector<8x256xi32>
    %c16_i32_19 = arith.constant 16 : i32
    %82 = vector.broadcast %c16_i32_19 : i32 to vector<8x256xi32>
    %83 = arith.shrui %81, %82 : vector<8x256xi32>
    %84 = arith.xori %81, %83 : vector<8x256xi32>
    %c9_i32_20 = arith.constant 9 : i32
    %85 = vector.broadcast %c9_i32_20 : i32 to vector<8x256xi32>
    %86 = arith.shrui %84, %85 : vector<8x256xi32>
    %c1065353216_i32_21 = arith.constant 1065353216 : i32
    %87 = vector.broadcast %c1065353216_i32_21 : i32 to vector<8x256xi32>
    %88 = arith.ori %86, %87 : vector<8x256xi32>
    %89 = tpu.bitcast %88 : vector<8x256xi32> -> vector<8x256xf32>
    %cst_22 = arith.constant 1.000000e+00 : f32
    %90 = vector.broadcast %cst_22 : f32 to vector<8x256xf32>
    %91 = arith.subf %89, %90 : vector<8x256xf32>
    %92 = arith.cmpf ogt, %68, %91 : vector<8x256xf32>
    %93 = arith.extui %92 : vector<8x256xi1> to vector<8x256xi32>
    %94 = arith.sitofp %93 : vector<8x256xi32> to vector<8x256xf32>
    %95 = arith.truncf %94 : vector<8x256xf32> to vector<8x256xbf16>
    %cst_23 = arith.constant dense<0.000000e+00> : vector<8x128xf32>
    %96 = tpu.matmul %95, %0, %cst_23 {dimension_numbers = #tpu.dot_dimension_numbers<[1], [1], [0], [0], [0, 0, 1, 0], [], []>} : vector<8x256xbf16>, vector<128x256xbf16>, vector<8x128xf32> -> vector<8x128xf32>
    %97 = arith.addf %96, %3 : vector<8x128xf32>
    %98 = arith.negf %97 : vector<8x128xf32>
    %99 = math.exp %98 : vector<8x128xf32>
    %cst_24 = arith.constant 1.000000e+00 : f32
    %100 = vector.broadcast %cst_24 : f32 to vector<8x128xf32>
    %101 = arith.addf %100, %99 : vector<8x128xf32>
    %102 = arith.divf %100, %101 : vector<8x128xf32>
    %c1013904242_i32 = arith.constant 1013904242 : i32
    %103 = arith.addi %26, %c1013904242_i32 : i32
    %104 = vector.broadcast %103 : i32 to vector<8x128xi32>
    %105 = arith.xori %16, %104 : vector<8x128xi32>
    %c16_i32_25 = arith.constant 16 : i32
    %106 = vector.broadcast %c16_i32_25 : i32 to vector<8x128xi32>
    %107 = arith.shrui %105, %106 : vector<8x128xi32>
    %108 = arith.xori %105, %107 : vector<8x128xi32>
    %c2146121005_i32_26 = arith.constant 2146121005 : i32
    %109 = vector.broadcast %c2146121005_i32_26 : i32 to vector<8x128xi32>
    %110 = arith.muli %108, %109 : vector<8x128xi32>
    %c15_i32_27 = arith.constant 15 : i32
    %111 = vector.broadcast %c15_i32_27 : i32 to vector<8x128xi32>
    %112 = arith.shrui %110, %111 : vector<8x128xi32>
    %113 = arith.xori %110, %112 : vector<8x128xi32>
    %c-2073254261_i32_28 = arith.constant -2073254261 : i32
    %114 = vector.broadcast %c-2073254261_i32_28 : i32 to vector<8x128xi32>
    %115 = arith.muli %113, %114 : vector<8x128xi32>
    %c16_i32_29 = arith.constant 16 : i32
    %116 = vector.broadcast %c16_i32_29 : i32 to vector<8x128xi32>
    %117 = arith.shrui %115, %116 : vector<8x128xi32>
    %118 = arith.xori %115, %117 : vector<8x128xi32>
    %c9_i32_30 = arith.constant 9 : i32
    %119 = vector.broadcast %c9_i32_30 : i32 to vector<8x128xi32>
    %120 = arith.shrui %118, %119 : vector<8x128xi32>
    %c1065353216_i32_31 = arith.constant 1065353216 : i32
    %121 = vector.broadcast %c1065353216_i32_31 : i32 to vector<8x128xi32>
    %122 = arith.ori %120, %121 : vector<8x128xi32>
    %123 = tpu.bitcast %122 : vector<8x128xi32> -> vector<8x128xf32>
    %cst_32 = arith.constant 1.000000e+00 : f32
    %124 = vector.broadcast %cst_32 : f32 to vector<8x128xf32>
    %125 = arith.subf %123, %124 : vector<8x128xf32>
    %126 = arith.cmpf ogt, %102, %125 : vector<8x128xf32>
    %127 = arith.extui %126 : vector<8x128xi1> to vector<8x128xi32>
    %128 = arith.sitofp %127 : vector<8x128xi32> to vector<8x128xf32>
    %129 = arith.truncf %128 : vector<8x128xf32> to vector<8x128xbf16>
    %cst_33 = arith.constant dense<0.000000e+00> : vector<8x256xf32>
    %130 = tpu.matmul %129, %0, %cst_33 {dimension_numbers = #tpu.dot_dimension_numbers<[1], [0], [0], [1], [0, 0, 1, 1], [], []>} : vector<8x128xbf16>, vector<128x256xbf16>, vector<8x256xf32> -> vector<8x256xf32>
    %131 = arith.addf %130, %6 : vector<8x256xf32>
    %132 = arith.negf %131 : vector<8x256xf32>
    %133 = math.exp %132 : vector<8x256xf32>
    %cst_34 = arith.constant 1.000000e+00 : f32
    %134 = vector.broadcast %cst_34 : f32 to vector<8x256xf32>
    %135 = arith.addf %134, %133 : vector<8x256xf32>
    %136 = arith.divf %134, %135 : vector<8x256xf32>
    %c-626627285_i32 = arith.constant -626627285 : i32
    %137 = arith.addi %26, %c-626627285_i32 : i32
    %138 = vector.broadcast %137 : i32 to vector<8x256xi32>
    %139 = arith.xori %25, %138 : vector<8x256xi32>
    %c16_i32_35 = arith.constant 16 : i32
    %140 = vector.broadcast %c16_i32_35 : i32 to vector<8x256xi32>
    %141 = arith.shrui %139, %140 : vector<8x256xi32>
    %142 = arith.xori %139, %141 : vector<8x256xi32>
    %c2146121005_i32_36 = arith.constant 2146121005 : i32
    %143 = vector.broadcast %c2146121005_i32_36 : i32 to vector<8x256xi32>
    %144 = arith.muli %142, %143 : vector<8x256xi32>
    %c15_i32_37 = arith.constant 15 : i32
    %145 = vector.broadcast %c15_i32_37 : i32 to vector<8x256xi32>
    %146 = arith.shrui %144, %145 : vector<8x256xi32>
    %147 = arith.xori %144, %146 : vector<8x256xi32>
    %c-2073254261_i32_38 = arith.constant -2073254261 : i32
    %148 = vector.broadcast %c-2073254261_i32_38 : i32 to vector<8x256xi32>
    %149 = arith.muli %147, %148 : vector<8x256xi32>
    %c16_i32_39 = arith.constant 16 : i32
    %150 = vector.broadcast %c16_i32_39 : i32 to vector<8x256xi32>
    %151 = arith.shrui %149, %150 : vector<8x256xi32>
    %152 = arith.xori %149, %151 : vector<8x256xi32>
    %c9_i32_40 = arith.constant 9 : i32
    %153 = vector.broadcast %c9_i32_40 : i32 to vector<8x256xi32>
    %154 = arith.shrui %152, %153 : vector<8x256xi32>
    %c1065353216_i32_41 = arith.constant 1065353216 : i32
    %155 = vector.broadcast %c1065353216_i32_41 : i32 to vector<8x256xi32>
    %156 = arith.ori %154, %155 : vector<8x256xi32>
    %157 = tpu.bitcast %156 : vector<8x256xi32> -> vector<8x256xf32>
    %cst_42 = arith.constant 1.000000e+00 : f32
    %158 = vector.broadcast %cst_42 : f32 to vector<8x256xf32>
    %159 = arith.subf %157, %158 : vector<8x256xf32>
    %160 = arith.cmpf ogt, %136, %159 : vector<8x256xf32>
    %161 = arith.extui %160 : vector<8x256xi1> to vector<8x256xi32>
    %162 = arith.sitofp %161 : vector<8x256xi32> to vector<8x256xf32>
    %163 = arith.truncf %162 : vector<8x256xf32> to vector<8x256xbf16>
    %cst_43 = arith.constant dense<0.000000e+00> : vector<8x128xf32>
    %164 = tpu.matmul %163, %0, %cst_43 {dimension_numbers = #tpu.dot_dimension_numbers<[1], [1], [0], [0], [0, 0, 1, 0], [], []>} : vector<8x256xbf16>, vector<128x256xbf16>, vector<8x128xf32> -> vector<8x128xf32>
    %165 = arith.addf %164, %3 : vector<8x128xf32>
    %166 = arith.negf %165 : vector<8x128xf32>
    %167 = math.exp %166 : vector<8x128xf32>
    %cst_44 = arith.constant 1.000000e+00 : f32
    %168 = vector.broadcast %cst_44 : f32 to vector<8x128xf32>
    %169 = arith.addf %168, %167 : vector<8x128xf32>
    %170 = arith.divf %168, %169 : vector<8x128xf32>
    %c2027808484_i32 = arith.constant 2027808484 : i32
    %171 = arith.addi %26, %c2027808484_i32 : i32
    %172 = vector.broadcast %171 : i32 to vector<8x128xi32>
    %173 = arith.xori %16, %172 : vector<8x128xi32>
    %c16_i32_45 = arith.constant 16 : i32
    %174 = vector.broadcast %c16_i32_45 : i32 to vector<8x128xi32>
    %175 = arith.shrui %173, %174 : vector<8x128xi32>
    %176 = arith.xori %173, %175 : vector<8x128xi32>
    %c2146121005_i32_46 = arith.constant 2146121005 : i32
    %177 = vector.broadcast %c2146121005_i32_46 : i32 to vector<8x128xi32>
    %178 = arith.muli %176, %177 : vector<8x128xi32>
    %c15_i32_47 = arith.constant 15 : i32
    %179 = vector.broadcast %c15_i32_47 : i32 to vector<8x128xi32>
    %180 = arith.shrui %178, %179 : vector<8x128xi32>
    %181 = arith.xori %178, %180 : vector<8x128xi32>
    %c-2073254261_i32_48 = arith.constant -2073254261 : i32
    %182 = vector.broadcast %c-2073254261_i32_48 : i32 to vector<8x128xi32>
    %183 = arith.muli %181, %182 : vector<8x128xi32>
    %c16_i32_49 = arith.constant 16 : i32
    %184 = vector.broadcast %c16_i32_49 : i32 to vector<8x128xi32>
    %185 = arith.shrui %183, %184 : vector<8x128xi32>
    %186 = arith.xori %183, %185 : vector<8x128xi32>
    %c9_i32_50 = arith.constant 9 : i32
    %187 = vector.broadcast %c9_i32_50 : i32 to vector<8x128xi32>
    %188 = arith.shrui %186, %187 : vector<8x128xi32>
    %c1065353216_i32_51 = arith.constant 1065353216 : i32
    %189 = vector.broadcast %c1065353216_i32_51 : i32 to vector<8x128xi32>
    %190 = arith.ori %188, %189 : vector<8x128xi32>
    %191 = tpu.bitcast %190 : vector<8x128xi32> -> vector<8x128xf32>
    %cst_52 = arith.constant 1.000000e+00 : f32
    %192 = vector.broadcast %cst_52 : f32 to vector<8x128xf32>
    %193 = arith.subf %191, %192 : vector<8x128xf32>
    %194 = arith.cmpf ogt, %170, %193 : vector<8x128xf32>
    %195 = arith.extui %194 : vector<8x128xi1> to vector<8x128xi32>
    %196 = arith.sitofp %195 : vector<8x128xi32> to vector<8x128xf32>
    %197 = arith.truncf %196 : vector<8x128xf32> to vector<8x128xbf16>
    %cst_53 = arith.constant dense<0.000000e+00> : vector<8x256xf32>
    %198 = tpu.matmul %197, %0, %cst_53 {dimension_numbers = #tpu.dot_dimension_numbers<[1], [0], [0], [1], [0, 0, 1, 1], [], []>} : vector<8x128xbf16>, vector<128x256xbf16>, vector<8x256xf32> -> vector<8x256xf32>
    %199 = arith.addf %198, %6 : vector<8x256xf32>
    %200 = arith.negf %199 : vector<8x256xf32>
    %201 = math.exp %200 : vector<8x256xf32>
    %cst_54 = arith.constant 1.000000e+00 : f32
    %202 = vector.broadcast %cst_54 : f32 to vector<8x256xf32>
    %203 = arith.addf %202, %201 : vector<8x256xf32>
    %204 = arith.divf %202, %203 : vector<8x256xf32>
    %c387276957_i32 = arith.constant 387276957 : i32
    %205 = arith.addi %26, %c387276957_i32 : i32
    %206 = vector.broadcast %205 : i32 to vector<8x256xi32>
    %207 = arith.xori %25, %206 : vector<8x256xi32>
    %c16_i32_55 = arith.constant 16 : i32
    %208 = vector.broadcast %c16_i32_55 : i32 to vector<8x256xi32>
    %209 = arith.shrui %207, %208 : vector<8x256xi32>
    %210 = arith.xori %207, %209 : vector<8x256xi32>
    %c2146121005_i32_56 = arith.constant 2146121005 : i32
    %211 = vector.broadcast %c2146121005_i32_56 : i32 to vector<8x256xi32>
    %212 = arith.muli %210, %211 : vector<8x256xi32>
    %c15_i32_57 = arith.constant 15 : i32
    %213 = vector.broadcast %c15_i32_57 : i32 to vector<8x256xi32>
    %214 = arith.shrui %212, %213 : vector<8x256xi32>
    %215 = arith.xori %212, %214 : vector<8x256xi32>
    %c-2073254261_i32_58 = arith.constant -2073254261 : i32
    %216 = vector.broadcast %c-2073254261_i32_58 : i32 to vector<8x256xi32>
    %217 = arith.muli %215, %216 : vector<8x256xi32>
    %c16_i32_59 = arith.constant 16 : i32
    %218 = vector.broadcast %c16_i32_59 : i32 to vector<8x256xi32>
    %219 = arith.shrui %217, %218 : vector<8x256xi32>
    %220 = arith.xori %217, %219 : vector<8x256xi32>
    %c9_i32_60 = arith.constant 9 : i32
    %221 = vector.broadcast %c9_i32_60 : i32 to vector<8x256xi32>
    %222 = arith.shrui %220, %221 : vector<8x256xi32>
    %c1065353216_i32_61 = arith.constant 1065353216 : i32
    %223 = vector.broadcast %c1065353216_i32_61 : i32 to vector<8x256xi32>
    %224 = arith.ori %222, %223 : vector<8x256xi32>
    %225 = tpu.bitcast %224 : vector<8x256xi32> -> vector<8x256xf32>
    %cst_62 = arith.constant 1.000000e+00 : f32
    %226 = vector.broadcast %cst_62 : f32 to vector<8x256xf32>
    %227 = arith.subf %225, %226 : vector<8x256xf32>
    %228 = arith.cmpf ogt, %204, %227 : vector<8x256xf32>
    %229 = arith.extui %228 : vector<8x256xi1> to vector<8x256xi32>
    %230 = arith.sitofp %229 : vector<8x256xi32> to vector<8x256xf32>
    %231 = arith.truncf %230 : vector<8x256xf32> to vector<8x256xbf16>
    %cst_63 = arith.constant dense<0.000000e+00> : vector<8x128xf32>
    %232 = tpu.matmul %231, %0, %cst_63 {dimension_numbers = #tpu.dot_dimension_numbers<[1], [1], [0], [0], [0, 0, 1, 0], [], []>} : vector<8x256xbf16>, vector<128x256xbf16>, vector<8x128xf32> -> vector<8x128xf32>
    %233 = arith.addf %232, %3 : vector<8x128xf32>
    %234 = arith.negf %233 : vector<8x128xf32>
    %235 = math.exp %234 : vector<8x128xf32>
    %cst_64 = arith.constant 1.000000e+00 : f32
    %236 = vector.broadcast %cst_64 : f32 to vector<8x128xf32>
    %237 = arith.addf %236, %235 : vector<8x128xf32>
    %238 = arith.divf %236, %237 : vector<8x128xf32>
    %c-1253254570_i32 = arith.constant -1253254570 : i32
    %239 = arith.addi %26, %c-1253254570_i32 : i32
    %240 = vector.broadcast %239 : i32 to vector<8x128xi32>
    %241 = arith.xori %16, %240 : vector<8x128xi32>
    %c16_i32_65 = arith.constant 16 : i32
    %242 = vector.broadcast %c16_i32_65 : i32 to vector<8x128xi32>
    %243 = arith.shrui %241, %242 : vector<8x128xi32>
    %244 = arith.xori %241, %243 : vector<8x128xi32>
    %c2146121005_i32_66 = arith.constant 2146121005 : i32
    %245 = vector.broadcast %c2146121005_i32_66 : i32 to vector<8x128xi32>
    %246 = arith.muli %244, %245 : vector<8x128xi32>
    %c15_i32_67 = arith.constant 15 : i32
    %247 = vector.broadcast %c15_i32_67 : i32 to vector<8x128xi32>
    %248 = arith.shrui %246, %247 : vector<8x128xi32>
    %249 = arith.xori %246, %248 : vector<8x128xi32>
    %c-2073254261_i32_68 = arith.constant -2073254261 : i32
    %250 = vector.broadcast %c-2073254261_i32_68 : i32 to vector<8x128xi32>
    %251 = arith.muli %249, %250 : vector<8x128xi32>
    %c16_i32_69 = arith.constant 16 : i32
    %252 = vector.broadcast %c16_i32_69 : i32 to vector<8x128xi32>
    %253 = arith.shrui %251, %252 : vector<8x128xi32>
    %254 = arith.xori %251, %253 : vector<8x128xi32>
    %c9_i32_70 = arith.constant 9 : i32
    %255 = vector.broadcast %c9_i32_70 : i32 to vector<8x128xi32>
    %256 = arith.shrui %254, %255 : vector<8x128xi32>
    %c1065353216_i32_71 = arith.constant 1065353216 : i32
    %257 = vector.broadcast %c1065353216_i32_71 : i32 to vector<8x128xi32>
    %258 = arith.ori %256, %257 : vector<8x128xi32>
    %259 = tpu.bitcast %258 : vector<8x128xi32> -> vector<8x128xf32>
    %cst_72 = arith.constant 1.000000e+00 : f32
    %260 = vector.broadcast %cst_72 : f32 to vector<8x128xf32>
    %261 = arith.subf %259, %260 : vector<8x128xf32>
    %262 = arith.cmpf ogt, %238, %261 : vector<8x128xf32>
    %263 = arith.extui %262 : vector<8x128xi1> to vector<8x128xi32>
    %264 = arith.sitofp %263 : vector<8x128xi32> to vector<8x128xf32>
    %265 = arith.truncf %264 : vector<8x128xf32> to vector<8x128xbf16>
    %cst_73 = arith.constant dense<0.000000e+00> : vector<8x256xf32>
    %266 = tpu.matmul %265, %0, %cst_73 {dimension_numbers = #tpu.dot_dimension_numbers<[1], [0], [0], [1], [0, 0, 1, 1], [], []>} : vector<8x128xbf16>, vector<128x256xbf16>, vector<8x256xf32> -> vector<8x256xf32>
    %267 = arith.addf %266, %6 : vector<8x256xf32>
    %268 = arith.negf %267 : vector<8x256xf32>
    %269 = math.exp %268 : vector<8x256xf32>
    %cst_74 = arith.constant 1.000000e+00 : f32
    %270 = vector.broadcast %cst_74 : f32 to vector<8x256xf32>
    %271 = arith.addf %270, %269 : vector<8x256xf32>
    %272 = arith.divf %270, %271 : vector<8x256xf32>
    %c1401181199_i32 = arith.constant 1401181199 : i32
    %273 = arith.addi %26, %c1401181199_i32 : i32
    %274 = vector.broadcast %273 : i32 to vector<8x256xi32>
    %275 = arith.xori %25, %274 : vector<8x256xi32>
    %c16_i32_75 = arith.constant 16 : i32
    %276 = vector.broadcast %c16_i32_75 : i32 to vector<8x256xi32>
    %277 = arith.shrui %275, %276 : vector<8x256xi32>
    %278 = arith.xori %275, %277 : vector<8x256xi32>
    %c2146121005_i32_76 = arith.constant 2146121005 : i32
    %279 = vector.broadcast %c2146121005_i32_76 : i32 to vector<8x256xi32>
    %280 = arith.muli %278, %279 : vector<8x256xi32>
    %c15_i32_77 = arith.constant 15 : i32
    %281 = vector.broadcast %c15_i32_77 : i32 to vector<8x256xi32>
    %282 = arith.shrui %280, %281 : vector<8x256xi32>
    %283 = arith.xori %280, %282 : vector<8x256xi32>
    %c-2073254261_i32_78 = arith.constant -2073254261 : i32
    %284 = vector.broadcast %c-2073254261_i32_78 : i32 to vector<8x256xi32>
    %285 = arith.muli %283, %284 : vector<8x256xi32>
    %c16_i32_79 = arith.constant 16 : i32
    %286 = vector.broadcast %c16_i32_79 : i32 to vector<8x256xi32>
    %287 = arith.shrui %285, %286 : vector<8x256xi32>
    %288 = arith.xori %285, %287 : vector<8x256xi32>
    %c9_i32_80 = arith.constant 9 : i32
    %289 = vector.broadcast %c9_i32_80 : i32 to vector<8x256xi32>
    %290 = arith.shrui %288, %289 : vector<8x256xi32>
    %c1065353216_i32_81 = arith.constant 1065353216 : i32
    %291 = vector.broadcast %c1065353216_i32_81 : i32 to vector<8x256xi32>
    %292 = arith.ori %290, %291 : vector<8x256xi32>
    %293 = tpu.bitcast %292 : vector<8x256xi32> -> vector<8x256xf32>
    %cst_82 = arith.constant 1.000000e+00 : f32
    %294 = vector.broadcast %cst_82 : f32 to vector<8x256xf32>
    %295 = arith.subf %293, %294 : vector<8x256xf32>
    %296 = arith.cmpf ogt, %272, %295 : vector<8x256xf32>
    %297 = arith.extui %296 : vector<8x256xi1> to vector<8x256xi32>
    %298 = arith.sitofp %297 : vector<8x256xi32> to vector<8x256xf32>
    %299 = arith.truncf %298 : vector<8x256xf32> to vector<8x256xbf16>
    %cst_83 = arith.constant dense<0.000000e+00> : vector<8x128xf32>
    %300 = tpu.matmul %299, %0, %cst_83 {dimension_numbers = #tpu.dot_dimension_numbers<[1], [1], [0], [0], [0, 0, 1, 0], [], []>} : vector<8x256xbf16>, vector<128x256xbf16>, vector<8x128xf32> -> vector<8x128xf32>
    %301 = arith.addf %300, %3 : vector<8x128xf32>
    %302 = arith.negf %301 : vector<8x128xf32>
    %303 = math.exp %302 : vector<8x128xf32>
    %cst_84 = arith.constant 1.000000e+00 : f32
    %304 = vector.broadcast %cst_84 : f32 to vector<8x128xf32>
    %305 = arith.addf %304, %303 : vector<8x128xf32>
    %306 = arith.divf %304, %305 : vector<8x128xf32>
    %c-239350328_i32 = arith.constant -239350328 : i32
    %307 = arith.addi %26, %c-239350328_i32 : i32
    %308 = vector.broadcast %307 : i32 to vector<8x128xi32>
    %309 = arith.xori %16, %308 : vector<8x128xi32>
    %c16_i32_85 = arith.constant 16 : i32
    %310 = vector.broadcast %c16_i32_85 : i32 to vector<8x128xi32>
    %311 = arith.shrui %309, %310 : vector<8x128xi32>
    %312 = arith.xori %309, %311 : vector<8x128xi32>
    %c2146121005_i32_86 = arith.constant 2146121005 : i32
    %313 = vector.broadcast %c2146121005_i32_86 : i32 to vector<8x128xi32>
    %314 = arith.muli %312, %313 : vector<8x128xi32>
    %c15_i32_87 = arith.constant 15 : i32
    %315 = vector.broadcast %c15_i32_87 : i32 to vector<8x128xi32>
    %316 = arith.shrui %314, %315 : vector<8x128xi32>
    %317 = arith.xori %314, %316 : vector<8x128xi32>
    %c-2073254261_i32_88 = arith.constant -2073254261 : i32
    %318 = vector.broadcast %c-2073254261_i32_88 : i32 to vector<8x128xi32>
    %319 = arith.muli %317, %318 : vector<8x128xi32>
    %c16_i32_89 = arith.constant 16 : i32
    %320 = vector.broadcast %c16_i32_89 : i32 to vector<8x128xi32>
    %321 = arith.shrui %319, %320 : vector<8x128xi32>
    %322 = arith.xori %319, %321 : vector<8x128xi32>
    %c9_i32_90 = arith.constant 9 : i32
    %323 = vector.broadcast %c9_i32_90 : i32 to vector<8x128xi32>
    %324 = arith.shrui %322, %323 : vector<8x128xi32>
    %c1065353216_i32_91 = arith.constant 1065353216 : i32
    %325 = vector.broadcast %c1065353216_i32_91 : i32 to vector<8x128xi32>
    %326 = arith.ori %324, %325 : vector<8x128xi32>
    %327 = tpu.bitcast %326 : vector<8x128xi32> -> vector<8x128xf32>
    %cst_92 = arith.constant 1.000000e+00 : f32
    %328 = vector.broadcast %cst_92 : f32 to vector<8x128xf32>
    %329 = arith.subf %327, %328 : vector<8x128xf32>
    %330 = arith.cmpf ogt, %306, %329 : vector<8x128xf32>
    %331 = arith.extui %330 : vector<8x128xi1> to vector<8x128xi32>
    %332 = arith.sitofp %331 : vector<8x128xi32> to vector<8x128xf32>
    %333 = arith.truncf %332 : vector<8x128xf32> to vector<8x128xbf16>
    %cst_93 = arith.constant dense<0.000000e+00> : vector<8x256xf32>
    %334 = tpu.matmul %333, %0, %cst_93 {dimension_numbers = #tpu.dot_dimension_numbers<[1], [0], [0], [1], [0, 0, 1, 1], [], []>} : vector<8x128xbf16>, vector<128x256xbf16>, vector<8x256xf32> -> vector<8x256xf32>
    %335 = arith.addf %334, %6 : vector<8x256xf32>
    %336 = arith.negf %335 : vector<8x256xf32>
    %337 = math.exp %336 : vector<8x256xf32>
    %cst_94 = arith.constant 1.000000e+00 : f32
    %338 = vector.broadcast %cst_94 : f32 to vector<8x256xf32>
    %339 = arith.addf %338, %337 : vector<8x256xf32>
    %340 = arith.divf %338, %339 : vector<8x256xf32>
    %c-1879881855_i32 = arith.constant -1879881855 : i32
    %341 = arith.addi %26, %c-1879881855_i32 : i32
    %342 = vector.broadcast %341 : i32 to vector<8x256xi32>
    %343 = arith.xori %25, %342 : vector<8x256xi32>
    %c16_i32_95 = arith.constant 16 : i32
    %344 = vector.broadcast %c16_i32_95 : i32 to vector<8x256xi32>
    %345 = arith.shrui %343, %344 : vector<8x256xi32>
    %346 = arith.xori %343, %345 : vector<8x256xi32>
    %c2146121005_i32_96 = arith.constant 2146121005 : i32
    %347 = vector.broadcast %c2146121005_i32_96 : i32 to vector<8x256xi32>
    %348 = arith.muli %346, %347 : vector<8x256xi32>
    %c15_i32_97 = arith.constant 15 : i32
    %349 = vector.broadcast %c15_i32_97 : i32 to vector<8x256xi32>
    %350 = arith.shrui %348, %349 : vector<8x256xi32>
    %351 = arith.xori %348, %350 : vector<8x256xi32>
    %c-2073254261_i32_98 = arith.constant -2073254261 : i32
    %352 = vector.broadcast %c-2073254261_i32_98 : i32 to vector<8x256xi32>
    %353 = arith.muli %351, %352 : vector<8x256xi32>
    %c16_i32_99 = arith.constant 16 : i32
    %354 = vector.broadcast %c16_i32_99 : i32 to vector<8x256xi32>
    %355 = arith.shrui %353, %354 : vector<8x256xi32>
    %356 = arith.xori %353, %355 : vector<8x256xi32>
    %c9_i32_100 = arith.constant 9 : i32
    %357 = vector.broadcast %c9_i32_100 : i32 to vector<8x256xi32>
    %358 = arith.shrui %356, %357 : vector<8x256xi32>
    %c1065353216_i32_101 = arith.constant 1065353216 : i32
    %359 = vector.broadcast %c1065353216_i32_101 : i32 to vector<8x256xi32>
    %360 = arith.ori %358, %359 : vector<8x256xi32>
    %361 = tpu.bitcast %360 : vector<8x256xi32> -> vector<8x256xf32>
    %cst_102 = arith.constant 1.000000e+00 : f32
    %362 = vector.broadcast %cst_102 : f32 to vector<8x256xf32>
    %363 = arith.subf %361, %362 : vector<8x256xf32>
    %364 = arith.cmpf ogt, %340, %363 : vector<8x256xf32>
    %365 = arith.extui %364 : vector<8x256xi1> to vector<8x256xi32>
    %366 = arith.sitofp %365 : vector<8x256xi32> to vector<8x256xf32>
    %367 = arith.truncf %366 : vector<8x256xf32> to vector<8x256xbf16>
    %368 = arith.extf %367 : vector<8x256xbf16> to vector<8x256xf32>
    %c0_103 = arith.constant 0 : index
    %c0_104 = arith.constant 0 : index
    %369 = vector.load %arg6[%c0_103, %c0_104] : memref<8x256xf32, #tpu.memory_space<vmem>>, vector<8x256xf32>
    tpu.vector_store %arg6[%c0_103, %c0_104], %368 {strides = array<i32>} : memref<8x256xf32, #tpu.memory_space<vmem>>, vector<8x256xf32>,
    return
  }
  func.func @transform_0(%arg0: i32, %arg1: memref<1xi32, #tpu.memory_space<smem>>) -> (i32, i32) {
    %c0_i32 = arith.constant 0 : i32
    %c0_i32_0 = arith.constant 0 : i32
    return %arg0, %c0_i32 : i32, i32
  }
  func.func @transform_1(%arg0: i32, %arg1: memref<1xi32, #tpu.memory_space<smem>>) -> (i32, i32) {
    %c0_i32 = arith.constant 0 : i32
    %c0_i32_0 = arith.constant 0 : i32
    %c0_i32_1 = arith.constant 0 : i32
    return %c0_i32, %c0_i32_0 : i32, i32
  }
  func.func @transform_2(%arg0: i32, %arg1: memref<1xi32, #tpu.memory_space<smem>>) -> (i32, i32) {
    %c0_i32 = arith.constant 0 : i32
    %c0_i32_0 = arith.constant 0 : i32
    %c0_i32_1 = arith.constant 0 : i32
    return %c0_i32, %c0_i32_0 : i32, i32
  }
  func.func @transform_3(%arg0: i32, %arg1: memref<1xi32, #tpu.memory_space<smem>>) -> (i32, i32) {
    %c0_i32 = arith.constant 0 : i32
    %c0_i32_0 = arith.constant 0 : i32
    %c0_i32_1 = arith.constant 0 : i32
    return %c0_i32, %c0_i32_0 : i32, i32
  }
  func.func @transform_4(%arg0: i32, %arg1: memref<1xi32, #tpu.memory_space<smem>>) -> (i32, i32) {
    %c0_i32 = arith.constant 0 : i32
    %c0_i32_0 = arith.constant 0 : i32
    return %arg0, %c0_i32 : i32, i32
  }
}

</mosaic_0001>

<bundles_post_ra>
// kernel: tpu_custom_call.1
= control target key start
LH: loop header
LB: loop body
LE: loop exit
PB: predicated region body
PF: predicated region fallthrough
CT: control target
= control target key end

     0   :  { %11 = vsyncpa [#allocation5], 0  ;;  %s1672_s0 = inlined_call_operand.<no memory space> [shape: s32[1], index: 0, kind: input, shape index: {}]   ;;  %s1673_s1 = inlined_call_operand.hbm [shape: bf16[8,256], index: 1, kind: input, shape index: {}]   ;;  %s1674_s2 = inlined_call_operand.hbm [shape: bf16[128,256], index: 2, kind: input, shape index: {}]   ;;  %s1675_s3 = inlined_call_operand.vmem [shape: f32[1,128], index: 3, kind: input, shape index: {}]   ;;  %s1676_s4 = inlined_call_operand.vmem [shape: f32[1,256], index: 4, kind: input, shape index: {}]   ;;  %s1677_s5 = inlined_call_operand.hbm [shape: f32[8,256], index: 5, kind: output, shape index: {}]  }
   0x1   :  { %12 = vsyncpa [#allocation8], 0 }
   0x2   :  { %13 = vsyncpa [#allocation6], 0  ;;  %s19_s20 = sshll.u32 %s1673_s1, 4  ;;  %s1327_s21 = smov [#allocation4]   ;;  %s20_s20 = int_to_ptr.hbm [resolvable:$true] %s19_s20 }
   0x3   :  { %s21_s22 = sshll.u32 %s1327_s21, 4  ;;  %s29_s25 = sshll.u32 %s1674_s2, 4  ;;  %s22_s22 = int_to_ptr.vmem [resolvable:$true] %s21_s22  ;;  %s30_s25 = int_to_ptr.hbm [resolvable:$true] %s29_s25 }
   0x4   :  { %24 = dma.hbm_to_vmem [thread:$0]  %s20_s20, 128, %s22_s22, [#allocation5]  }
   0x5   :  { %s1328_s26 = smov [#allocation7]   ;;  %s1329_s28 = smov 128  }
   0x6   :  { %s31_s27 = sshll.u32 %s1328_s26, 4  ;;  %s1330_s29 = smov 8   ;;  %s32_s27 = int_to_ptr.vmem [resolvable:$true] %s31_s27 }
   0x7   :  { %37 = dma.hbm_to_vmem [thread:$0]  %s30_s25, 2048, %s32_s27, [#allocation8], %s1329_s28, %s1329_s28, %s1330_s29  }
   0x8   :  { %1321 = dma.done.wait [#allocation5], 128  }
   0x9   :  { %1322 = vsyncadd [#allocation5], 4294967168 }
   0xa   :  { %1323 = dma.done.wait [#allocation8], 2048  }
   0xb   :  { %1324 = vsyncadd [#allocation8], 4294965248  ;;  %v1077_v0 = vld [vmem:[#allocation7 + $0x70] sm:$0xf]  ;;  %v1179_v1 = vld [vmem:[#allocation7 + $0x74] sm:$0xf0]  ;;  %v77_v53 = vlaneseq  ;;  %v223_v59 = vstv %s1672_s0 }
   0xc   :  { %v1178_v2 = vld [vmem:[#allocation7 + $0x74] sm:$0xf]  ;;  %v1370_v3 = vor.u32 %v1179_v1, %v1077_v0  ;;  %v1079_v4 = vld [vmem:[#allocation7 + $0x78] sm:$0xf0]  ;;  %v1069_v6 = vld [vmem:[#allocation7 + $0x60] sm:$0xf] }
   0xd   :  { %v1372_v5 = vor.u32 %v1178_v2, %v1079_v4  ;;  %v1177_v7 = vld [vmem:[#allocation7 + $0x64] sm:$0xf0]  ;;  %v1176_v8 = vld [vmem:[#allocation7 + $0x64] sm:$0xf]  ;;  %v1071_v9 = vld [vmem:[#allocation7 + $0x68] sm:$0xf0] }
   0xe   :  { %178 = vmatpush.bf16.xpose.msra.mxu0 %v1370_v3  ;;  %241 = vmatpush.bf16.msra.mxu2 %v1370_v3  ;;  %v1378_v10 = vor.u32 %v1177_v7, %v1069_v6  ;;  %v1380_v11 = vor.u32 %v1176_v8, %v1071_v9  ;;  %v1061_v12 = vld [vmem:[#allocation7 + $0x50] sm:$0xf]  ;;  %v1175_v13 = vld [vmem:[#allocation7 + $0x54] sm:$0xf0]  ;;  %v1174_v14 = vld [vmem:[#allocation7 + $0x54] sm:$0xf] }
   0xf   :  { %191 = vmatpush.bf16.xpose.msra.mxu1 %v1372_v5  ;;  %254 = vmatpush.bf16.msra.mxu3 %v1372_v5  ;;  %v1063_v15 = vld [vmem:[#allocation7 + $0x58] sm:$0xf0]  ;;  %v1384_v16 = vor.u32 %v1175_v13, %v1061_v12  ;;  %v1053_v18 = vld [vmem:[#allocation7 + $0x40] sm:$0xf]  ;;  %v1173_v19 = vld [vmem:[#allocation7 + $0x44] sm:$0xf0] }
  0x10   :  { %v1386_v17 = vor.u32 %v1174_v14, %v1063_v15  ;;  %v1172_v20 = vld [vmem:[#allocation7 + $0x44] sm:$0xf]  ;;  %v1055_v21 = vld [vmem:[#allocation7 + $0x48] sm:$0xf0]  ;;  %v1392_v22 = vor.u32 %v1173_v19, %v1053_v18  ;;  %v1045_v24 = vld [vmem:[#allocation7 + $0x30] sm:$0xf] }
  0x11   :  { %v1394_v23 = vor.u32 %v1172_v20, %v1055_v21  ;;  %v1171_v25 = vld [vmem:[#allocation7 + $0x34] sm:$0xf0]  ;;  %v1170_v26 = vld [vmem:[#allocation7 + $0x34] sm:$0xf]  ;;  %v1047_v27 = vld [vmem:[#allocation7 + $0x38] sm:$0xf0] }
  0x12   :  { %242 = vmatpush.bf16.msra.mxu2 %v1378_v10  ;;  %v1398_v28 = vor.u32 %v1171_v25, %v1045_v24  ;;  %v1400_v29 = vor.u32 %v1170_v26, %v1047_v27  ;;  %v1037_v30 = vld [vmem:[#allocation7 + $0x20] sm:$0xf]  ;;  %v1169_v31 = vld [vmem:[#allocation7 + $0x24] sm:$0xf0]  ;;  %v1168_v32 = vld [vmem:[#allocation7 + $0x24] sm:$0xf] }
  0x13   :  { %255 = vmatpush.bf16.msra.mxu3 %v1380_v11  ;;  %v1039_v33 = vld [vmem:[#allocation7 + $0x28] sm:$0xf0]  ;;  %v1406_v34 = vor.u32 %v1169_v31, %v1037_v30  ;;  %v1029_v36 = vld [vmem:[#allocation7 + $0x10] sm:$0xf]  ;;  %v1167_v37 = vld [vmem:[#allocation7 + $0x14] sm:$0xf0] }
  0x14   :  { %v1408_v35 = vor.u32 %v1168_v32, %v1039_v33  ;;  %v1166_v38 = vld [vmem:[#allocation7 + $0x14] sm:$0xf]  ;;  %v1031_v39 = vld [vmem:[#allocation7 + $0x18] sm:$0xf0]  ;;  %v1412_v40 = vor.u32 %v1167_v37, %v1029_v36  ;;  %v1021_v42 = vld [vmem:[#allocation7] sm:$0xf] }
  0x15   :  { %v1414_v41 = vor.u32 %v1166_v38, %v1031_v39  ;;  %v1165_v43 = vld [vmem:[#allocation7 + $0x4] sm:$0xf0]  ;;  %v1164_v44 = vld [vmem:[#allocation7 + $0x4] sm:$0xf]  ;;  %v1023_v45 = vld [vmem:[#allocation7 + $0x8] sm:$0xf0] }
  0x16   :  { %179 = vmatpush.bf16.xpose.msra.mxu0 %v1378_v10  ;;  %243 = vmatpush.bf16.msra.mxu2 %v1384_v16  ;;  %v1420_v46 = vor.u32 %v1165_v43, %v1021_v42  ;;  %v1422_v47 = vor.u32 %v1164_v44, %v1023_v45  ;;  %v90_v48 = vld [vmem:[#allocation4] sm:$0xff]  ;;  %v1482_v54 = vshrl.u32 %v77_v53, 7  ;;  %v1484_v55 = vand.u32 127, %v77_v53  ;;  %s305_s9 = sadd.s32 2654435769, %s1672_s0 }
  0x17   :  { %192 = vmatpush.bf16.xpose.msra.mxu1 %v1380_v11  ;;  %256 = vmatpush.bf16.msra.mxu3 %v1386_v17  ;;  %v92_v49 = vunpack.c.l.b16 %v90_v48  ;;  %v93_v50 = vunpack.c.h.b16 %v90_v48  ;;  %v1499_v63 = vld [vmem:[%s1675_s3] ss:$0 sm:$0xff]  ;;  %v1331_v42 = vmov 1.0|1.0   ;;  %v306_v45 = vstv %s305_s9  ;;  %s386_s13 = sadd.s32 1013904242, %s1672_s0 }
  0x18   :  { %v83_v56 = vmul.u32 2246822507, %v1482_v54  ;;  %v84_v57 = vmul.u32 3266489909, %v1484_v55  ;;  %v86_v43 = vadd.s32 128, %v1484_v55 }
  0x19   :  { %v94_v51 = vpack.c.b16 %v92_v49, %v92_v49  ;;  %v95_v52 = vpack.c.b16 %v93_v50, %v93_v50  ;;  %v70_v55 = vld [vmem:[%s1676_s4] sm:$0x3]  ;;  %s469_s16 = sadd.s32 3668340011, %s1672_s0  ;;  %s550_s19 = sadd.s32 2027808484, %s1672_s0 }
  0x1a   :  { %244 = vmatpush.bf16.msra.mxu2 %v1392_v22  ;;  %v1490_v58 = vadd.s32 %v84_v57, %v83_v56  ;;  %v87_v44 = vmul.u32 3266489909, %v86_v43  ;;  %s633_s22 = sadd.s32 387276957, %s1672_s0  ;;  %s714_s25 = sadd.s32 3041712726, %s1672_s0 }
  0x1b   :  { %257 = vmatpush.bf16.msra.mxu3 %v1394_v23  ;;  %s797_s28 = sadd.s32 1401181199, %s1672_s0  ;;  %s878_s2 = sadd.s32 4055616968, %s1672_s0 }
  0x1c   :  { %v224_v60 = vxor.u32 %v223_v59, %v1490_v58  ;;  %v1526_v48 = vadd.s32 %v87_v44, %v83_v56  ;;  %v307_v49 = vxor.u32 %v306_v45, %v1490_v58  ;;  %s961_s8 = sadd.s32 2415085441, %s1672_s0  ;;  %s1332_s0 = smov [#allocation9]  }
  0x1d   :  { %s1006_s9 = sshll.u32 %s1332_s0, 4  ;;  %s1008_s4 = sshll.u32 %s1677_s5, 4  ;;  %s1007_s9 = int_to_ptr.vmem [resolvable:$true] %s1006_s9  ;;  %s1009_s4 = int_to_ptr.hbm [resolvable:$true] %s1008_s4 }
  0x1e   :  { %180 = vmatpush.bf16.xpose.msra.mxu0 %v1384_v16  ;;  %245 = vmatpush.bf16.msra.mxu2 %v1398_v28  ;;  %v225_v61 = vshrl.u32 %v224_v60, 16  ;;  %v308_v50 = vxor.u32 %v306_v45, %v1526_v48 }
  0x1f   :  { %193 = vmatpush.bf16.xpose.msra.mxu1 %v1386_v17  ;;  %258 = vmatpush.bf16.msra.mxu3 %v1400_v29 }
  0x20   :  { %v226_v62 = vxor.u32 %v225_v61, %v224_v60  ;;  %v1533_v61 = vperm.slane %v70_v55, 0 }
  0x22   :  { %246 = vmatpush.bf16.msra.mxu2 %v1406_v34  ;;  %v227_v0 = vmul.u32 2146121005, %v226_v62  ;;  %v1535_v62 = vperm.slane %v70_v55, 1 }
  0x23   :  { %259 = vmatpush.bf16.msra.mxu3 %v1408_v35 }
  0x24   :  { %v228_v6 = vshrl.u32 %v227_v0, 15 }
  0x26   :  { %181 = vmatpush.bf16.xpose.msra.mxu0 %v1392_v22  ;;  %247 = vmatpush.bf16.msra.mxu2 %v1412_v40  ;;  %v229_v9 = vxor.u32 %v228_v6, %v227_v0 }
  0x27   :  { %194 = vmatpush.bf16.xpose.msra.mxu1 %v1394_v23  ;;  %260 = vmatpush.bf16.msra.mxu3 %v1414_v41 }
  0x28   :  { %v230_v14 = vmul.u32 2221713035, %v229_v9 }
  0x2a   :  { %248 = vmatpush.bf16.msra.mxu2 %v1420_v46  ;;  %v231_v18 = vshrl.u32 %v230_v14, 16 }
  0x2b   :  { %261 = vmatpush.bf16.msra.mxu3 %v1422_v47 }
  0x2c   :  { %v232_v20 = vxor.u32 %v231_v18, %v230_v14 }
  0x2e   :  { %341 = vmatpush.bf16.xpose.msrb.mxu2 %v1370_v3  ;;  %182 = vmatpush.bf16.xpose.msra.mxu0 %v1398_v28  ;;  %v233_v21 = vshrl.u32 %v232_v20, 9 }
  0x2f   :  { %354 = vmatpush.bf16.xpose.msrb.mxu3 %v1372_v5  ;;  %195 = vmatpush.bf16.xpose.msra.mxu1 %v1400_v29 }
  0x30   :  { %v234_v27 = vor.u32 1065353216, %v233_v21 }
  0x32   :  { %v1084_v36 = vadd.f32 -1.0, %v234_v27 }
  0x36   :  { %342 = vmatpush.bf16.xpose.msrb.mxu2 %v1378_v10  ;;  %183 = vmatpush.bf16.xpose.msra.mxu0 %v1406_v34 }
  0x37   :  { %355 = vmatpush.bf16.xpose.msrb.mxu3 %v1380_v11  ;;  %196 = vmatpush.bf16.xpose.msra.mxu1 %v1408_v35 }
  0x3e   :  { %343 = vmatpush.bf16.xpose.msrb.mxu2 %v1384_v16  ;;  %184 = vmatpush.bf16.xpose.msra.mxu0 %v1412_v40 }
  0x3f   :  { %356 = vmatpush.bf16.xpose.msrb.mxu3 %v1386_v17  ;;  %197 = vmatpush.bf16.xpose.msra.mxu1 %v1414_v41 }
  0x46   :  { %344 = vmatpush.bf16.xpose.msrb.mxu2 %v1392_v22  ;;  %185 = vmatpush.bf16.xpose.msra.mxu0 %v1420_v46 }
  0x47   :  { %357 = vmatpush.bf16.xpose.msrb.mxu3 %v1394_v23  ;;  %198 = vmatpush.bf16.xpose.msra.mxu1 %v1422_v47 }
  0x4d   :  { %186 = vmatmul.bf16.vlgmr.msra.gmra.mxu0 %v94_v51  ;;  %v309_v51 = vshrl.u32 %v307_v49, 16 }
  0x4e   :  { %405 = vmatpush.bf16.msrb.mxu0 %v1370_v3  ;;  %345 = vmatpush.bf16.xpose.msrb.mxu2 %v1398_v28 }
  0x4f   :  { %418 = vmatpush.bf16.msrb.mxu1 %v1372_v5  ;;  %358 = vmatpush.bf16.xpose.msrb.mxu3 %v1400_v29  ;;  %v311_v53 = vxor.u32 %v309_v51, %v307_v49 }
  0x50   :  { %199 = vmatmul.bf16.vlgmr.msra.gmra.mxu1 %v95_v52  ;;  %v310_v52 = vshrl.u32 %v308_v50, 16 }
  0x51   :  { %v313_v59 = vmul.u32 2146121005, %v311_v53 }
  0x52   :  { %406 = vmatpush.bf16.msrb.mxu0 %v1378_v10  ;;  %v312_v57 = vxor.u32 %v310_v52, %v308_v50 }
  0x53   :  { %419 = vmatpush.bf16.msrb.mxu1 %v1380_v11  ;;  %v315_v54 = vshrl.u32 %v313_v59, 15 }
  0x54   :  { %v314_v60 = vmul.u32 2146121005, %v312_v57 }
  0x56   :  { %407 = vmatpush.bf16.msrb.mxu0 %v1384_v16  ;;  %346 = vmatpush.bf16.xpose.msrb.mxu2 %v1406_v34 }
  0x57   :  { %420 = vmatpush.bf16.msrb.mxu1 %v1386_v17  ;;  %359 = vmatpush.bf16.xpose.msrb.mxu3 %v1408_v35 }
  0x5a   :  { %408 = vmatpush.bf16.msrb.mxu0 %v1392_v22 }
  0x5b   :  { %421 = vmatpush.bf16.msrb.mxu1 %v1394_v23 }
  0x5e   :  { %409 = vmatpush.bf16.msrb.mxu0 %v1398_v28  ;;  %347 = vmatpush.bf16.xpose.msrb.mxu2 %v1412_v40 }
  0x5f   :  { %422 = vmatpush.bf16.msrb.mxu1 %v1400_v29  ;;  %360 = vmatpush.bf16.xpose.msrb.mxu3 %v1414_v41 }
  0x62   :  { %410 = vmatpush.bf16.msrb.mxu0 %v1406_v34 }
  0x63   :  { %423 = vmatpush.bf16.msrb.mxu1 %v1408_v35 }
  0x66   :  { %411 = vmatpush.bf16.msrb.mxu0 %v1412_v40  ;;  %348 = vmatpush.bf16.xpose.msrb.mxu2 %v1420_v46 }
  0x67   :  { %424 = vmatpush.bf16.msrb.mxu1 %v1414_v41  ;;  %361 = vmatpush.bf16.xpose.msrb.mxu3 %v1422_v47 }
  0x6a   :  { %412 = vmatpush.bf16.msrb.mxu0 %v1420_v46 }
  0x6b   :  { %425 = vmatpush.bf16.msrb.mxu1 %v1422_v47 }
  0x6e   :  { %505 = vmatpush.bf16.xpose.msra.mxu0 %v1370_v3 }
  0x6f   :  { %518 = vmatpush.bf16.xpose.msra.mxu1 %v1372_v5 }
  0x76   :  { %506 = vmatpush.bf16.xpose.msra.mxu0 %v1378_v10 }
  0x77   :  { %519 = vmatpush.bf16.xpose.msra.mxu1 %v1380_v11 }
  0x7e   :  { %507 = vmatpush.bf16.xpose.msra.mxu0 %v1384_v16 }
  0x7f   :  { %520 = vmatpush.bf16.xpose.msra.mxu1 %v1386_v17 }
  0x86   :  { %508 = vmatpush.bf16.xpose.msra.mxu0 %v1392_v22 }
  0x87   :  { %521 = vmatpush.bf16.xpose.msra.mxu1 %v1394_v23 }
  0x8e   :  { %509 = vmatpush.bf16.xpose.msra.mxu0 %v1398_v28 }
  0x8f   :  { %522 = vmatpush.bf16.xpose.msra.mxu1 %v1400_v29 }
  0x96   :  { %510 = vmatpush.bf16.xpose.msra.mxu0 %v1406_v34 }
  0x97   :  { %523 = vmatpush.bf16.xpose.msra.mxu1 %v1408_v35 }
  0x9e   :  { %511 = vmatpush.bf16.xpose.msra.mxu0 %v1412_v40 }
  0x9f   :  { %524 = vmatpush.bf16.xpose.msra.mxu1 %v1414_v41 }
  0xa6   :  { %512 = vmatpush.bf16.xpose.msra.mxu0 %v1420_v46 }
  0xa7   :  { %525 = vmatpush.bf16.xpose.msra.mxu1 %v1422_v47 }
  0xca   :  { %v187_v1 = vpop.f32.mrf.mxu0 }
  0xcb   :  { %v188_v2 = vadd.f32 %v1499_v63, %v187_v1  ;;  %v316_v1 = vshrl.u32 %v314_v60, 15 }
  0xcd   :  { %v200_v4 = vpop.f32.mrf.mxu1  ;;  %v318_v9 = vxor.u32 %v316_v1, %v314_v60 }
  0xce   :  { %v201_v7 = vadd.f32 %v200_v4, %v188_v2 }
  0xd0   :  { %v1083_v8 = vmul.f32 -1.442695, %v201_v7 }
  0xd2   :  { %1188 = vpow2.f32 %v1083_v8  ;;  %v189_v12 = vpop.f32.mrf.mxu0  ;;  %v317_v8 = vxor.u32 %v315_v54, %v313_v59 }
  0xd4   :  { %v319_v12 = vmul.u32 2221713035, %v317_v8 }
  0xd5   :  { %v202_v13 = vpop.f32.mrf.mxu1 }
  0xd8   :  { %v1189_v15 = vpop.eup %1188 }
  0xd9   :  { %v207_v19 = vadd.f32 1.0, %v1189_v15  ;;  %v320_v15 = vmul.u32 2221713035, %v318_v9 }
  0xdb   :  { %1190 = vrcp.f32 %v207_v19  ;;  %v219_v30 = vand.u32 2147483648, %v207_v19  ;;  %v217_v32 = vand.u32 2147483647, %v207_v19  ;;  %vm213_vm1 = vweird.f32 %v207_v19 }
  0xdd   :  { %v220_v37 = vor.u32 1.1754944e-38, %v219_v30  ;;  %vm218_vm3 = vcmp.eq.f32.partialorder %v217_v32, 8.507059e+37 }
  0xe1   :  { %v1191_v24 = vpop.eup %1190 }
  0xe2   :  { %v209_v25 = vmul.f32 %v1191_v24, %v207_v19  ;;  %vm214_vm0 = vweird.f32 %v1191_v24  ;;  %v321_v19 = vshrl.u32 %v319_v12, 16 }
  0xe3   :  { %vm215_vm2 = vmor %vm213_vm1, %vm214_vm0 }
  0xe4   :  { %v210_v26 = vsub.f32 1.0, %v209_v25 }
  0xe6   :  { %v211_v31 = vmul.f32 %v1191_v24, %v210_v26  ;;  %v323_v26 = vxor.u32 %v321_v19, %v319_v12 }
  0xe8   :  { %v212_v33 = vadd.f32 %v1191_v24, %v211_v31  ;;  %v325_v30 = vshrl.u32 %v323_v26, 9 }
  0xea   :  { %v216_v38 = vsel %vm215_vm2, %v1191_v24, %v212_v33  ;;  %v322_v24 = vshrl.u32 %v320_v15, 16 }
  0xeb   :  { %v221_v39 = vsel %vm218_vm3, %v220_v37, %v216_v38 }
  0xec   :  { %vm237_vm4 = vcmp.gt.f32.partialorder %v221_v39, %v1084_v36  ;;  %v324_v27 = vxor.u32 %v322_v24, %v320_v15  ;;  %v327_v39 = vor.u32 1065353216, %v325_v30 }
  0xed   :  { %vm1086_vm5 = vmpackc.low %vm237_vm4, %vm237_vm4 }
  0xee   :  { %1087 = vmatmul.msk.bf16.vlgmr.msra.gmra.mxu2 %vm1086_vm5, %v1331_v42  ;;  %1089 = vmatmul.msk.bf16.vlgmr.msra.gmra.mxu3 %vm1086_vm5, %v1331_v42  ;;  %v326_v32 = vshrl.u32 %v324_v27, 9  ;;  %v1092_v55 = vadd.f32 -1.0, %v327_v39 }
  0xef   :  { %569 = vmatpush.bf16.msra.mxu2 %v1370_v3  ;;  %582 = vmatpush.bf16.msra.mxu3 %v1372_v5 }
  0xf0   :  { %v328_v45 = vor.u32 1065353216, %v326_v32 }
  0xf2   :  { %v1093_v54 = vadd.f32 -1.0, %v328_v45 }
  0xf3   :  { %570 = vmatpush.bf16.msra.mxu2 %v1378_v10  ;;  %583 = vmatpush.bf16.msra.mxu3 %v1380_v11 }
  0xf7   :  { %571 = vmatpush.bf16.msra.mxu2 %v1384_v16  ;;  %584 = vmatpush.bf16.msra.mxu3 %v1386_v17 }
  0xfb   :  { %572 = vmatpush.bf16.msra.mxu2 %v1392_v22  ;;  %585 = vmatpush.bf16.msra.mxu3 %v1394_v23 }
  0xff   :  { %573 = vmatpush.bf16.msra.mxu2 %v1398_v28  ;;  %586 = vmatpush.bf16.msra.mxu3 %v1400_v29 }
 0x103   :  { %574 = vmatpush.bf16.msra.mxu2 %v1406_v34  ;;  %587 = vmatpush.bf16.msra.mxu3 %v1408_v35 }
 0x107   :  { %575 = vmatpush.bf16.msra.mxu2 %v1412_v40  ;;  %588 = vmatpush.bf16.msra.mxu3 %v1414_v41 }
 0x10b   :  { %576 = vmatpush.bf16.msra.mxu2 %v1420_v46  ;;  %589 = vmatpush.bf16.msra.mxu3 %v1422_v47 }
 0x171   :  { %v250_v56 = vpop.f32.mrf.mxu2  ;;  %v263_v0 = vpop.f32.mrf.mxu3 }
 0x172   :  { %v251_v2 = vadd.f32 %v250_v56, %v1533_v61  ;;  %v264_v4 = vadd.f32 %v263_v0, %v1535_v62 }
 0x174   :  { %v1090_v6 = vmul.f32 -1.442695, %v251_v2  ;;  %v1091_v7 = vmul.f32 -1.442695, %v264_v4 }
 0x176   :  { %1192 = vpow2.f32 %v1090_v6  ;;  %v387_v6 = vstv %s386_s13 }
 0x177   :  { %1194 = vpow2.f32 %v1091_v7  ;;  %v388_v7 = vxor.u32 %v387_v6, %v1490_v58 }
 0x179   :  { %v252_v13 = vpop.f32.mrf.mxu2  ;;  %v265_v14 = vpop.f32.mrf.mxu3  ;;  %v389_v8 = vshrl.u32 %v388_v7, 16 }
 0x17b   :  { %v390_v9 = vxor.u32 %v389_v8, %v388_v7 }
 0x17c   :  { %v1193_v18 = vpop.eup %1192 }
 0x17d   :  { %v1195_v20 = vpop.eup %1194  ;;  %v273_v21 = vadd.f32 1.0, %v1193_v18  ;;  %v391_v12 = vmul.u32 2146121005, %v390_v9 }
 0x17e   :  { %v274_v25 = vadd.f32 1.0, %v1195_v20 }
 0x17f   :  { %1196 = vrcp.f32 %v273_v21  ;;  %v286_v43 = vand.u32 2147483648, %v273_v21  ;;  %v284_v50 = vand.u32 2147483647, %v273_v21  ;;  %vm280_vm8 = vweird.f32 %v273_v21 }
 0x180   :  { %1198 = vrcp.f32 %v274_v25  ;;  %v301_v51 = vand.u32 2147483648, %v274_v25  ;;  %v299_v53 = vand.u32 2147483647, %v274_v25  ;;  %vm295_vm10 = vweird.f32 %v274_v25 }
 0x181   :  { %v287_v59 = vor.u32 1.1754944e-38, %v286_v43  ;;  %vm285_vm11 = vcmp.eq.f32.partialorder %v284_v50, 8.507059e+37  ;;  %v392_v18 = vshrl.u32 %v391_v12, 15 }
 0x182   :  { %v302_v0 = vor.u32 1.1754944e-38, %v301_v51  ;;  %vm300_vm13 = vcmp.eq.f32.partialorder %v299_v53, 8.507059e+37 }
 0x185   :  { %v1197_v31 = vpop.eup %1196 }
 0x186   :  { %v1199_v33 = vpop.eup %1198  ;;  %v276_v36 = vmul.f32 %v1197_v31, %v273_v21  ;;  %vm281_vm6 = vweird.f32 %v1197_v31  ;;  %v393_v21 = vxor.u32 %v392_v18, %v391_v12 }
 0x187   :  { %v291_v37 = vmul.f32 %v1199_v33, %v274_v25  ;;  %vm296_vm7 = vweird.f32 %v1199_v33  ;;  %vm282_vm9 = vmor %vm280_vm8, %vm281_vm6 }
 0x188   :  { %v277_v38 = vsub.f32 1.0, %v276_v36  ;;  %vm297_vm12 = vmor %vm295_vm10, %vm296_vm7  ;;  %v394_v26 = vmul.u32 2221713035, %v393_v21 }
 0x189   :  { %v292_v44 = vsub.f32 1.0, %v291_v37 }
 0x18a   :  { %v278_v49 = vmul.f32 %v1197_v31, %v277_v38  ;;  %v395_v30 = vshrl.u32 %v394_v26, 16 }
 0x18b   :  { %v293_v52 = vmul.f32 %v1199_v33, %v292_v44 }
 0x18c   :  { %v279_v57 = vadd.f32 %v1197_v31, %v278_v49  ;;  %v396_v32 = vxor.u32 %v395_v30, %v394_v26 }
 0x18d   :  { %v294_v60 = vadd.f32 %v1199_v33, %v293_v52 }
 0x18e   :  { %v283_v56 = vsel %vm282_vm9, %v1197_v31, %v279_v57  ;;  %v470_v57 = vstv %s469_s16 }
 0x18f   :  { %v288_v1 = vsel %vm285_vm11, %v287_v59, %v283_v56  ;;  %v298_v2 = vsel %vm297_vm12, %v1199_v33, %v294_v60  ;;  %v397_v33 = vshrl.u32 %v396_v32, 9  ;;  %v472_v59 = vxor.u32 %v470_v57, %v1526_v48 }
 0x190   :  { %vm333_vm14 = vcmp.gt.f32.partialorder %v288_v1, %v1092_v55  ;;  %v303_v4 = vsel %vm300_vm13, %v302_v0, %v298_v2  ;;  %v471_v55 = vxor.u32 %v470_v57, %v1490_v58 }
 0x191   :  { %vm1096_vm15 = vmpackc.low %vm333_vm14, %vm333_vm14  ;;  %vm334_vm0 = vcmp.gt.f32.partialorder %v303_v4, %v1093_v54  ;;  %v398_v39 = vor.u32 1065353216, %v397_v33  ;;  %v474_v54 = vshrl.u32 %v472_v59, 16 }
 0x192   :  { %1097 = vmatmul.msk.bf16.vlgmr.msrb.gmra.mxu2 %vm1096_vm15, %v1331_v42  ;;  %vm1098_vm1 = vmpackc.low %vm334_vm0, %vm334_vm0  ;;  %v473_v60 = vshrl.u32 %v471_v55, 16 }
 0x193   :  { %1099 = vmatmul.msk.bf16.vlgmr.msrb.gmra.mxu3 %vm1098_vm1, %v1331_v42  ;;  %669 = vmatpush.bf16.xpose.msrb.mxu2 %v1370_v3  ;;  %v1101_v50 = vadd.f32 -1.0, %v398_v39  ;;  %v476_v0 = vxor.u32 %v474_v54, %v472_v59 }
 0x194   :  { %682 = vmatpush.bf16.xpose.msrb.mxu3 %v1372_v5  ;;  %v475_v56 = vxor.u32 %v473_v60, %v471_v55 }
 0x195   :  { %v478_v2 = vmul.u32 2146121005, %v476_v0 }
 0x196   :  { %v477_v1 = vmul.u32 2146121005, %v475_v56 }
 0x197   :  { %v480_v8 = vshrl.u32 %v478_v2, 15 }
 0x198   :  { %v479_v4 = vshrl.u32 %v477_v1, 15 }
 0x199   :  { %v482_v18 = vxor.u32 %v480_v8, %v478_v2 }
 0x19b   :  { %670 = vmatpush.bf16.xpose.msrb.mxu2 %v1378_v10 }
 0x19c   :  { %683 = vmatpush.bf16.xpose.msrb.mxu3 %v1380_v11 }
 0x1a3   :  { %671 = vmatpush.bf16.xpose.msrb.mxu2 %v1384_v16 }
 0x1a4   :  { %684 = vmatpush.bf16.xpose.msrb.mxu3 %v1386_v17 }
 0x1ab   :  { %672 = vmatpush.bf16.xpose.msrb.mxu2 %v1392_v22 }
 0x1ac   :  { %685 = vmatpush.bf16.xpose.msrb.mxu3 %v1394_v23 }
 0x1b3   :  { %673 = vmatpush.bf16.xpose.msrb.mxu2 %v1398_v28 }
 0x1b4   :  { %686 = vmatpush.bf16.xpose.msrb.mxu3 %v1400_v29 }
 0x1bb   :  { %674 = vmatpush.bf16.xpose.msrb.mxu2 %v1406_v34 }
 0x1bc   :  { %687 = vmatpush.bf16.xpose.msrb.mxu3 %v1408_v35 }
 0x1c3   :  { %675 = vmatpush.bf16.xpose.msrb.mxu2 %v1412_v40 }
 0x1c4   :  { %688 = vmatpush.bf16.xpose.msrb.mxu3 %v1414_v41 }
 0x1cb   :  { %676 = vmatpush.bf16.xpose.msrb.mxu2 %v1420_v46 }
 0x1cc   :  { %689 = vmatpush.bf16.xpose.msrb.mxu3 %v1422_v47 }
 0x215   :  { %v350_v13 = vpop.f32.mrf.mxu2 }
 0x216   :  { %v351_v14 = vadd.f32 %v1499_v63, %v350_v13  ;;  %v363_v15 = vpop.f32.mrf.mxu3 }
 0x218   :  { %v364_v19 = vadd.f32 %v363_v15, %v351_v14  ;;  %v481_v15 = vxor.u32 %v479_v4, %v477_v1 }
 0x21a   :  { %v1100_v20 = vmul.f32 -1.442695, %v364_v19  ;;  %v483_v19 = vmul.u32 2221713035, %v481_v15 }
 0x21c   :  { %1200 = vpow2.f32 %v1100_v20  ;;  %v485_v26 = vshrl.u32 %v483_v19, 16 }
 0x21d   :  { %v352_v24 = vpop.f32.mrf.mxu2 }
 0x21e   :  { %v365_v25 = vpop.f32.mrf.mxu3  ;;  %v484_v24 = vmul.u32 2221713035, %v482_v18  ;;  %v487_v33 = vxor.u32 %v485_v26, %v483_v19 }
 0x222   :  { %v1201_v27 = vpop.eup %1200 }
 0x223   :  { %v370_v31 = vadd.f32 1.0, %v1201_v27 }
 0x225   :  { %1202 = vrcp.f32 %v370_v31  ;;  %v382_v43 = vand.u32 2147483648, %v370_v31  ;;  %v380_v45 = vand.u32 2147483647, %v370_v31  ;;  %vm376_vm3 = vweird.f32 %v370_v31 }
 0x227   :  { %v383_v51 = vor.u32 1.1754944e-38, %v382_v43  ;;  %vm381_vm5 = vcmp.eq.f32.partialorder %v380_v45, 8.507059e+37 }
 0x22b   :  { %v1203_v36 = vpop.eup %1202 }
 0x22c   :  { %v372_v37 = vmul.f32 %v1203_v36, %v370_v31  ;;  %vm377_vm2 = vweird.f32 %v1203_v36  ;;  %v486_v31 = vshrl.u32 %v484_v24, 16 }
 0x22d   :  { %vm378_vm4 = vmor %vm376_vm3, %vm377_vm2 }
 0x22e   :  { %v373_v38 = vsub.f32 1.0, %v372_v37  ;;  %v489_v37 = vshrl.u32 %v487_v33, 9 }
 0x230   :  { %v374_v44 = vmul.f32 %v1203_v36, %v373_v38 }
 0x232   :  { %v375_v49 = vadd.f32 %v1203_v36, %v374_v44 }
 0x234   :  { %v379_v52 = vsel %vm378_vm4, %v1203_v36, %v375_v49  ;;  %v488_v36 = vxor.u32 %v486_v31, %v484_v24 }
 0x235   :  { %v384_v53 = vsel %vm381_vm5, %v383_v51, %v379_v52 }
 0x236   :  { %vm401_vm6 = vcmp.gt.f32.partialorder %v384_v53, %v1101_v50  ;;  %v490_v39 = vshrl.u32 %v488_v36, 9  ;;  %v491_v50 = vor.u32 1065353216, %v489_v37 }
 0x237   :  { %vm1103_vm7 = vmpackc.low %vm401_vm6, %vm401_vm6 }
 0x238   :  { %1104 = vmatmul.msk.bf16.vlgmr.msrb.gmra.mxu0 %vm1103_vm7, %v1331_v42  ;;  %1106 = vmatmul.msk.bf16.vlgmr.msrb.gmra.mxu1 %vm1103_vm7, %v1331_v42  ;;  %v492_v53 = vor.u32 1065353216, %v490_v39  ;;  %v1109_v0 = vadd.f32 -1.0, %v491_v50 }
 0x239   :  { %733 = vmatpush.bf16.msrb.mxu0 %v1370_v3  ;;  %746 = vmatpush.bf16.msrb.mxu1 %v1372_v5 }
 0x23a   :  { %v1110_v4 = vadd.f32 -1.0, %v492_v53 }
 0x23d   :  { %734 = vmatpush.bf16.msrb.mxu0 %v1378_v10  ;;  %747 = vmatpush.bf16.msrb.mxu1 %v1380_v11 }
 0x241   :  { %735 = vmatpush.bf16.msrb.mxu0 %v1384_v16  ;;  %748 = vmatpush.bf16.msrb.mxu1 %v1386_v17 }
 0x245   :  { %736 = vmatpush.bf16.msrb.mxu0 %v1392_v22  ;;  %749 = vmatpush.bf16.msrb.mxu1 %v1394_v23 }
 0x249   :  { %737 = vmatpush.bf16.msrb.mxu0 %v1398_v28  ;;  %750 = vmatpush.bf16.msrb.mxu1 %v1400_v29 }
 0x24d   :  { %738 = vmatpush.bf16.msrb.mxu0 %v1406_v34  ;;  %751 = vmatpush.bf16.msrb.mxu1 %v1408_v35 }
 0x251   :  { %739 = vmatpush.bf16.msrb.mxu0 %v1412_v40  ;;  %752 = vmatpush.bf16.msrb.mxu1 %v1414_v41 }
 0x255   :  { %740 = vmatpush.bf16.msrb.mxu0 %v1420_v46  ;;  %753 = vmatpush.bf16.msrb.mxu1 %v1422_v47 }
 0x2b5   :  { %v414_v6 = vpop.f32.mrf.mxu0  ;;  %v427_v7 = vpop.f32.mrf.mxu1 }
 0x2b6   :  { %v415_v9 = vadd.f32 %v414_v6, %v1533_v61  ;;  %v428_v12 = vadd.f32 %v427_v7, %v1535_v62 }
 0x2b8   :  { %v1107_v13 = vmul.f32 -1.442695, %v415_v9  ;;  %v1108_v14 = vmul.f32 -1.442695, %v428_v12 }
 0x2ba   :  { %1204 = vpow2.f32 %v1107_v13  ;;  %v551_v13 = vstv %s550_s19 }
 0x2bb   :  { %1206 = vpow2.f32 %v1108_v14  ;;  %v552_v14 = vxor.u32 %v551_v13, %v1490_v58 }
 0x2bd   :  { %v416_v20 = vpop.f32.mrf.mxu0  ;;  %v429_v21 = vpop.f32.mrf.mxu1  ;;  %v553_v15 = vshrl.u32 %v552_v14, 16 }
 0x2bf   :  { %v554_v18 = vxor.u32 %v553_v15, %v552_v14 }
 0x2c0   :  { %v1205_v25 = vpop.eup %1204 }
 0x2c1   :  { %v1207_v27 = vpop.eup %1206  ;;  %v437_v30 = vadd.f32 1.0, %v1205_v25  ;;  %v555_v19 = vmul.u32 2146121005, %v554_v18 }
 0x2c2   :  { %v438_v32 = vadd.f32 1.0, %v1207_v27 }
 0x2c3   :  { %1208 = vrcp.f32 %v437_v30  ;;  %v450_v52 = vand.u32 2147483648, %v437_v30  ;;  %v448_v55 = vand.u32 2147483647, %v437_v30  ;;  %vm444_vm10 = vweird.f32 %v437_v30 }
 0x2c4   :  { %1210 = vrcp.f32 %v438_v32  ;;  %v465_v59 = vand.u32 2147483648, %v438_v32  ;;  %v463_v54 = vand.u32 2147483647, %v438_v32  ;;  %vm459_vm12 = vweird.f32 %v438_v32 }
 0x2c5   :  { %v451_v1 = vor.u32 1.1754944e-38, %v450_v52  ;;  %vm449_vm13 = vcmp.eq.f32.partialorder %v448_v55, 8.507059e+37  ;;  %v556_v25 = vshrl.u32 %v555_v19, 15 }
 0x2c6   :  { %v466_v7 = vor.u32 1.1754944e-38, %v465_v59  ;;  %vm464_vm15 = vcmp.eq.f32.partialorder %v463_v54, 8.507059e+37 }
 0x2c9   :  { %v1209_v38 = vpop.eup %1208 }
 0x2ca   :  { %v1211_v43 = vpop.eup %1210  ;;  %v440_v44 = vmul.f32 %v1209_v38, %v437_v30  ;;  %vm445_vm8 = vweird.f32 %v1209_v38  ;;  %v557_v30 = vxor.u32 %v556_v25, %v555_v19 }
 0x2cb   :  { %v455_v45 = vmul.f32 %v1211_v43, %v438_v32  ;;  %vm460_vm9 = vweird.f32 %v1211_v43  ;;  %vm446_vm11 = vmor %vm444_vm10, %vm445_vm8 }
 0x2cc   :  { %v441_v49 = vsub.f32 1.0, %v440_v44  ;;  %vm461_vm14 = vmor %vm459_vm12, %vm460_vm9  ;;  %v558_v33 = vmul.u32 2221713035, %v557_v30 }
 0x2cd   :  { %v456_v51 = vsub.f32 1.0, %v455_v45 }
 0x2ce   :  { %v442_v57 = vmul.f32 %v1209_v38, %v441_v49  ;;  %v559_v37 = vshrl.u32 %v558_v33, 16 }
 0x2cf   :  { %v457_v60 = vmul.f32 %v1211_v43, %v456_v51 }
 0x2d0   :  { %v443_v56 = vadd.f32 %v1209_v38, %v442_v57  ;;  %v560_v39 = vxor.u32 %v559_v37, %v558_v33 }
 0x2d1   :  { %v458_v2 = vadd.f32 %v1211_v43, %v457_v60 }
 0x2d2   :  { %v447_v6 = vsel %vm446_vm11, %v1209_v38, %v443_v56 }
 0x2d3   :  { %v452_v8 = vsel %vm449_vm13, %v451_v1, %v447_v6  ;;  %v462_v9 = vsel %vm461_vm14, %v1211_v43, %v458_v2  ;;  %v561_v43 = vshrl.u32 %v560_v39, 9 }
 0x2d4   :  { %vm497_vm0 = vcmp.gt.f32.partialorder %v452_v8, %v1109_v0  ;;  %v467_v12 = vsel %vm464_vm15, %v466_v7, %v462_v9 }
 0x2d5   :  { %vm1113_vm1 = vmpackc.low %vm497_vm0, %vm497_vm0  ;;  %vm498_vm2 = vcmp.gt.f32.partialorder %v467_v12, %v1110_v4  ;;  %v562_v50 = vor.u32 1065353216, %v561_v43 }
 0x2d6   :  { %1114 = vmatmul.msk.bf16.vlgmr.msra.gmra.mxu0 %vm1113_vm1, %v1331_v42  ;;  %vm1115_vm3 = vmpackc.low %vm498_vm2, %vm498_vm2 }
 0x2d7   :  { %1116 = vmatmul.msk.bf16.vlgmr.msra.gmra.mxu1 %vm1115_vm3, %v1331_v42  ;;  %833 = vmatpush.bf16.xpose.msra.mxu0 %v1370_v3  ;;  %v1118_v55 = vadd.f32 -1.0, %v562_v50 }
 0x2d8   :  { %846 = vmatpush.bf16.xpose.msra.mxu1 %v1372_v5 }
 0x2df   :  { %834 = vmatpush.bf16.xpose.msra.mxu0 %v1378_v10 }
 0x2e0   :  { %847 = vmatpush.bf16.xpose.msra.mxu1 %v1380_v11 }
 0x2e7   :  { %835 = vmatpush.bf16.xpose.msra.mxu0 %v1384_v16 }
 0x2e8   :  { %848 = vmatpush.bf16.xpose.msra.mxu1 %v1386_v17 }
 0x2ef   :  { %836 = vmatpush.bf16.xpose.msra.mxu0 %v1392_v22 }
 0x2f0   :  { %849 = vmatpush.bf16.xpose.msra.mxu1 %v1394_v23 }
 0x2f7   :  { %837 = vmatpush.bf16.xpose.msra.mxu0 %v1398_v28 }
 0x2f8   :  { %850 = vmatpush.bf16.xpose.msra.mxu1 %v1400_v29 }
 0x2ff   :  { %838 = vmatpush.bf16.xpose.msra.mxu0 %v1406_v34 }
 0x300   :  { %851 = vmatpush.bf16.xpose.msra.mxu1 %v1408_v35 }
 0x307   :  { %839 = vmatpush.bf16.xpose.msra.mxu0 %v1412_v40 }
 0x308   :  { %852 = vmatpush.bf16.xpose.msra.mxu1 %v1414_v41 }
 0x30f   :  { %840 = vmatpush.bf16.xpose.msra.mxu0 %v1420_v46 }
 0x310   :  { %853 = vmatpush.bf16.xpose.msra.mxu1 %v1422_v47 }
 0x353   :  { %v514_v20 = vpop.f32.mrf.mxu0 }
 0x354   :  { %v515_v21 = vadd.f32 %v1499_v63, %v514_v20  ;;  %v527_v24 = vpop.f32.mrf.mxu1 }
 0x356   :  { %v528_v26 = vadd.f32 %v527_v24, %v515_v21 }
 0x358   :  { %v1117_v27 = vmul.f32 -1.442695, %v528_v26 }
 0x35a   :  { %1212 = vpow2.f32 %v1117_v27 }
 0x35b   :  { %v516_v31 = vpop.f32.mrf.mxu0 }
 0x35c   :  { %v529_v32 = vpop.f32.mrf.mxu1 }
 0x360   :  { %v1213_v36 = vpop.eup %1212 }
 0x361   :  { %v534_v38 = vadd.f32 1.0, %v1213_v36 }
 0x363   :  { %1214 = vrcp.f32 %v534_v38  ;;  %v546_v51 = vand.u32 2147483648, %v534_v38  ;;  %v544_v53 = vand.u32 2147483647, %v534_v38  ;;  %vm540_vm5 = vweird.f32 %v534_v38 }
 0x365   :  { %v547_v59 = vor.u32 1.1754944e-38, %v546_v51  ;;  %vm545_vm7 = vcmp.eq.f32.partialorder %v544_v53, 8.507059e+37 }
 0x369   :  { %v1215_v44 = vpop.eup %1214 }
 0x36a   :  { %v536_v45 = vmul.f32 %v1215_v44, %v534_v38  ;;  %vm541_vm4 = vweird.f32 %v1215_v44 }
 0x36b   :  { %vm542_vm6 = vmor %vm540_vm5, %vm541_vm4 }
 0x36c   :  { %v537_v49 = vsub.f32 1.0, %v536_v45 }
 0x36e   :  { %v538_v52 = vmul.f32 %v1215_v44, %v537_v49 }
 0x370   :  { %v539_v57 = vadd.f32 %v1215_v44, %v538_v52 }
 0x372   :  { %v543_v60 = vsel %vm542_vm6, %v1215_v44, %v539_v57 }
 0x373   :  { %v548_v54 = vsel %vm545_vm7, %v547_v59, %v543_v60 }
 0x374   :  { %vm565_vm8 = vcmp.gt.f32.partialorder %v548_v54, %v1118_v55  ;;  %v715_v54 = vstv %s714_s25 }
 0x375   :  { %vm1120_vm9 = vmpackc.low %vm565_vm8, %vm565_vm8 }
 0x376   :  { %1121 = vmatmul.msk.bf16.vlgmr.msra.gmra.mxu2 %vm1120_vm9, %v1331_v42  ;;  %1123 = vmatmul.msk.bf16.vlgmr.msra.gmra.mxu3 %vm1120_vm9, %v1331_v42 }
 0x377   :  { %897 = vmatpush.bf16.msra.mxu2 %v1370_v3  ;;  %910 = vmatpush.bf16.msra.mxu3 %v1372_v5  ;;  %v634_v3 = vstv %s633_s22 }
 0x378   :  { %v635_v5 = vxor.u32 %v634_v3, %v1490_v58 }
 0x37b   :  { %898 = vmatpush.bf16.msra.mxu2 %v1378_v10  ;;  %911 = vmatpush.bf16.msra.mxu3 %v1380_v11  ;;  %v636_v10 = vxor.u32 %v634_v3, %v1526_v48  ;;  %v637_v11 = vshrl.u32 %v635_v5, 16  ;;  %v716_v3 = vxor.u32 %v715_v54, %v1490_v58 }
 0x37f   :  { %899 = vmatpush.bf16.msra.mxu2 %v1384_v16  ;;  %912 = vmatpush.bf16.msra.mxu3 %v1386_v17  ;;  %v638_v16 = vshrl.u32 %v636_v10, 16  ;;  %v639_v17 = vxor.u32 %v637_v11, %v635_v5  ;;  %v717_v5 = vshrl.u32 %v716_v3, 16 }
 0x383   :  { %900 = vmatpush.bf16.msra.mxu2 %v1392_v22  ;;  %913 = vmatpush.bf16.msra.mxu3 %v1394_v23  ;;  %v640_v22 = vxor.u32 %v638_v16, %v636_v10  ;;  %v641_v23 = vmul.u32 2146121005, %v639_v17  ;;  %v718_v10 = vxor.u32 %v717_v5, %v716_v3 }
 0x385   :  { %v719_v11 = vmul.u32 2146121005, %v718_v10 }
 0x387   :  { %901 = vmatpush.bf16.msra.mxu2 %v1398_v28  ;;  %914 = vmatpush.bf16.msra.mxu3 %v1400_v29  ;;  %v642_v28 = vmul.u32 2146121005, %v640_v22  ;;  %v643_v29 = vshrl.u32 %v641_v23, 15 }
 0x389   :  { %v645_v0 = vxor.u32 %v643_v29, %v641_v23  ;;  %v720_v23 = vshrl.u32 %v719_v11, 15 }
 0x38b   :  { %902 = vmatpush.bf16.msra.mxu2 %v1406_v34  ;;  %915 = vmatpush.bf16.msra.mxu3 %v1408_v35  ;;  %v647_v2 = vmul.u32 2221713035, %v645_v0 }
 0x38d   :  { %v649_v9 = vshrl.u32 %v647_v2, 16 }
 0x38f   :  { %903 = vmatpush.bf16.msra.mxu2 %v1412_v40  ;;  %916 = vmatpush.bf16.msra.mxu3 %v1414_v41  ;;  %v644_v40 = vshrl.u32 %v642_v28, 15  ;;  %v651_v18 = vxor.u32 %v649_v9, %v647_v2 }
 0x391   :  { %v646_v1 = vxor.u32 %v644_v40, %v642_v28  ;;  %v653_v20 = vshrl.u32 %v651_v18, 9 }
 0x393   :  { %904 = vmatpush.bf16.msra.mxu2 %v1420_v46  ;;  %917 = vmatpush.bf16.msra.mxu3 %v1422_v47  ;;  %v648_v7 = vmul.u32 2221713035, %v646_v1  ;;  %v655_v31 = vor.u32 1065353216, %v653_v20 }
 0x395   :  { %v650_v14 = vshrl.u32 %v648_v7, 16  ;;  %v1126_v49 = vadd.f32 -1.0, %v655_v31 }
 0x397   :  { %v652_v19 = vxor.u32 %v650_v14, %v648_v7 }
 0x399   :  { %v654_v24 = vshrl.u32 %v652_v19, 9  ;;  %v798_v19 = vstv %s797_s28 }
 0x39a   :  { %v799_v20 = vxor.u32 %v798_v19, %v1490_v58 }
 0x39b   :  { %v656_v36 = vor.u32 1065353216, %v654_v24 }
 0x39c   :  { %v801_v24 = vshrl.u32 %v799_v20, 16 }
 0x39d   :  { %v1127_v52 = vadd.f32 -1.0, %v656_v36 }
 0x3f9   :  { %v578_v34 = vpop.f32.mrf.mxu2  ;;  %v591_v35 = vpop.f32.mrf.mxu3 }
 0x3fa   :  { %v579_v41 = vadd.f32 %v578_v34, %v1533_v61  ;;  %v592_v46 = vadd.f32 %v591_v35, %v1535_v62  ;;  %v721_v34 = vxor.u32 %v720_v23, %v719_v11 }
 0x3fc   :  { %v1124_v47 = vmul.f32 -1.442695, %v579_v41  ;;  %v1125_v56 = vmul.f32 -1.442695, %v592_v46  ;;  %v722_v41 = vmul.u32 2221713035, %v721_v34 }
 0x3fe   :  { %1216 = vpow2.f32 %v1124_v47  ;;  %v723_v47 = vshrl.u32 %v722_v41, 16 }
 0x3ff   :  { %1218 = vpow2.f32 %v1125_v56 }
 0x400   :  { %v724_v0 = vxor.u32 %v723_v47, %v722_v41 }
 0x401   :  { %v580_v4 = vpop.f32.mrf.mxu2  ;;  %v593_v6 = vpop.f32.mrf.mxu3 }
 0x402   :  { %v725_v1 = vshrl.u32 %v724_v0, 9 }
 0x404   :  { %v1217_v8 = vpop.eup %1216  ;;  %v726_v7 = vor.u32 1065353216, %v725_v1 }
 0x405   :  { %v1219_v12 = vpop.eup %1218  ;;  %v601_v13 = vadd.f32 1.0, %v1217_v8 }
 0x406   :  { %v602_v15 = vadd.f32 1.0, %v1219_v12 }
 0x407   :  { %1220 = vrcp.f32 %v601_v13  ;;  %v614_v33 = vand.u32 2147483648, %v601_v13  ;;  %v612_v38 = vand.u32 2147483647, %v601_v13  ;;  %vm608_vm12 = vweird.f32 %v601_v13 }
 0x408   :  { %1222 = vrcp.f32 %v602_v15  ;;  %v629_v39 = vand.u32 2147483648, %v602_v15  ;;  %v627_v44 = vand.u32 2147483647, %v602_v15  ;;  %vm623_vm14 = vweird.f32 %v602_v15 }
 0x409   :  { %v615_v50 = vor.u32 1.1754944e-38, %v614_v33  ;;  %vm613_vm15 = vcmp.eq.f32.partialorder %v612_v38, 8.507059e+37 }
 0x40a   :  { %v630_v57 = vor.u32 1.1754944e-38, %v629_v39  ;;  %vm628_vm1 = vcmp.eq.f32.partialorder %v627_v44, 8.507059e+37 }
 0x40d   :  { %v1221_v21 = vpop.eup %1220 }
 0x40e   :  { %v1223_v25 = vpop.eup %1222  ;;  %v604_v26 = vmul.f32 %v1221_v21, %v601_v13  ;;  %vm609_vm10 = vweird.f32 %v1221_v21  ;;  %v1135_v13 = vadd.f32 -1.0, %v726_v7 }
 0x40f   :  { %v619_v27 = vmul.f32 %v1223_v25, %v602_v15  ;;  %vm624_vm11 = vweird.f32 %v1223_v25  ;;  %vm610_vm13 = vmor %vm608_vm12, %vm609_vm10 }
 0x410   :  { %v605_v30 = vsub.f32 1.0, %v604_v26  ;;  %vm625_vm0 = vmor %vm623_vm14, %vm624_vm11  ;;  %v803_v26 = vxor.u32 %v801_v24, %v799_v20 }
 0x411   :  { %v620_v32 = vsub.f32 1.0, %v619_v27 }
 0x412   :  { %v606_v37 = vmul.f32 %v1221_v21, %v605_v30  ;;  %v805_v30 = vmul.u32 2146121005, %v803_v26 }
 0x413   :  { %v621_v43 = vmul.f32 %v1223_v25, %v620_v32 }
 0x414   :  { %v607_v45 = vadd.f32 %v1221_v21, %v606_v37  ;;  %v807_v32 = vshrl.u32 %v805_v30, 15 }
 0x415   :  { %v622_v51 = vadd.f32 %v1223_v25, %v621_v43 }
 0x416   :  { %v611_v53 = vsel %vm610_vm13, %v1221_v21, %v607_v45  ;;  %v800_v21 = vxor.u32 %v798_v19, %v1526_v48  ;;  %v809_v45 = vxor.u32 %v807_v32, %v805_v30 }
 0x417   :  { %v616_v55 = vsel %vm613_vm15, %v615_v50, %v611_v53  ;;  %v626_v59 = vsel %vm625_vm0, %v1223_v25, %v622_v51 }
 0x418   :  { %vm661_vm2 = vcmp.gt.f32.partialorder %v616_v55, %v1126_v49  ;;  %v631_v60 = vsel %vm628_vm1, %v630_v57, %v626_v59  ;;  %v802_v25 = vshrl.u32 %v800_v21, 16  ;;  %v811_v50 = vmul.u32 2221713035, %v809_v45 }
 0x419   :  { %vm1130_vm3 = vmpackc.low %vm661_vm2, %vm661_vm2  ;;  %vm662_vm4 = vcmp.gt.f32.partialorder %v631_v60, %v1127_v52 }
 0x41a   :  { %1131 = vmatmul.msk.bf16.vlgmr.msrb.gmra.mxu2 %vm1130_vm3, %v1331_v42  ;;  %vm1132_vm5 = vmpackc.low %vm662_vm4, %vm662_vm4  ;;  %v804_v27 = vxor.u32 %v802_v25, %v800_v21  ;;  %v813_v55 = vshrl.u32 %v811_v50, 16  ;;  %v1248_v25 = vld [vmem:[%s1675_s3] ss:$0 sm:$0xff] }
 0x41b   :  { %1133 = vmatmul.msk.bf16.vlgmr.msrb.gmra.mxu3 %vm1132_vm5, %v1331_v42 }
 0x41c   :  { %v806_v31 = vmul.u32 2146121005, %v804_v27  ;;  %v815_v5 = vxor.u32 %v813_v55, %v811_v50 }
 0x41e   :  { %v808_v37 = vshrl.u32 %v806_v31, 15  ;;  %v817_v11 = vshrl.u32 %v815_v5, 9 }
 0x420   :  { %v810_v49 = vxor.u32 %v808_v37, %v806_v31  ;;  %v819_v34 = vor.u32 1065353216, %v817_v11  ;;  %v962_v11 = vstv %s961_s8 }
 0x422   :  { %v812_v53 = vmul.u32 2221713035, %v810_v49 }
 0x424   :  { %v814_v54 = vshrl.u32 %v812_v53, 16 }
 0x426   :  { %v816_v10 = vxor.u32 %v814_v54, %v812_v53 }
 0x49d   :  { %v678_v16 = vpop.f32.mrf.mxu2 }
 0x49e   :  { %v679_v17 = vadd.f32 %v1499_v63, %v678_v16  ;;  %v691_v22 = vpop.f32.mrf.mxu3 }
 0x4a0   :  { %v692_v28 = vadd.f32 %v691_v22, %v679_v17  ;;  %v818_v17 = vshrl.u32 %v816_v10, 9 }
 0x4a2   :  { %v1134_v29 = vmul.f32 -1.442695, %v692_v28  ;;  %v820_v41 = vor.u32 1065353216, %v818_v17  ;;  %v964_v17 = vxor.u32 %v962_v11, %v1526_v48 }
 0x4a4   :  { %1224 = vpow2.f32 %v1134_v29 }
 0x4a5   :  { %v680_v35 = vpop.f32.mrf.mxu2 }
 0x4a6   :  { %v693_v40 = vpop.f32.mrf.mxu3 }
 0x4aa   :  { %v1225_v46 = vpop.eup %1224 }
 0x4ab   :  { %v698_v56 = vadd.f32 1.0, %v1225_v46 }
 0x4ad   :  { %1226 = vrcp.f32 %v698_v56  ;;  %v710_v63 = vand.u32 2147483648, %v698_v56  ;;  %v708_v9 = vand.u32 2147483647, %v698_v56  ;;  %vm704_vm7 = vweird.f32 %v698_v56 }
 0x4af   :  { %v711_v14 = vor.u32 1.1754944e-38, %v710_v63  ;;  %vm709_vm9 = vcmp.eq.f32.partialorder %v708_v9, 8.507059e+37  ;;  %v1144_v63 = vadd.f32 -1.0, %v820_v41 }
 0x4b3   :  { %v1227_v2 = vpop.eup %1226 }
 0x4b4   :  { %v700_v4 = vmul.f32 %v1227_v2, %v698_v56  ;;  %vm705_vm6 = vweird.f32 %v1227_v2 }
 0x4b5   :  { %vm706_vm8 = vmor %vm704_vm7, %vm705_vm6 }
 0x4b6   :  { %v701_v6 = vsub.f32 1.0, %v700_v4  ;;  %v1143_v4 = vadd.f32 -1.0, %v819_v34 }
 0x4b8   :  { %v702_v8 = vmul.f32 %v1227_v2, %v701_v6 }
 0x4ba   :  { %v703_v12 = vadd.f32 %v1227_v2, %v702_v8 }
 0x4bc   :  { %v707_v15 = vsel %vm706_vm8, %v1227_v2, %v703_v12 }
 0x4bd   :  { %v712_v18 = vsel %vm709_vm9, %v711_v14, %v707_v15  ;;  %v879_v15 = vstv %s878_s2 }
 0x4be   :  { %vm729_vm10 = vcmp.gt.f32.partialorder %v712_v18, %v1135_v13  ;;  %v880_v18 = vxor.u32 %v879_v15, %v1490_v58 }
 0x4bf   :  { %vm1137_vm11 = vmpackc.low %vm729_vm10, %vm729_vm10 }
 0x4c0   :  { %1138 = vmatmul.msk.bf16.vlgmr.msrb.gmra.mxu0 %vm1137_vm11, %v1331_v42  ;;  %1140 = vmatmul.msk.bf16.vlgmr.msrb.gmra.mxu1 %vm1137_vm11, %v1331_v42  ;;  %v881_v19 = vshrl.u32 %v880_v18, 16 }
 0x4c2   :  { %v882_v20 = vxor.u32 %v881_v19, %v880_v18 }
 0x4c4   :  { %v883_v21 = vmul.u32 2146121005, %v882_v20 }
 0x4c6   :  { %v884_v30 = vshrl.u32 %v883_v21, 15 }
 0x53d   :  { %v742_v33 = vpop.f32.mrf.mxu0  ;;  %v755_v36 = vpop.f32.mrf.mxu1 }
 0x53e   :  { %v743_v38 = vadd.f32 %v742_v33, %v1533_v61  ;;  %v756_v39 = vadd.f32 %v755_v36, %v1535_v62  ;;  %v885_v33 = vxor.u32 %v884_v30, %v883_v21 }
 0x540   :  { %v1141_v43 = vmul.f32 -1.442695, %v743_v38  ;;  %v1142_v44 = vmul.f32 -1.442695, %v756_v39  ;;  %v886_v38 = vmul.u32 2221713035, %v885_v33 }
 0x542   :  { %1228 = vpow2.f32 %v1141_v43  ;;  %v887_v43 = vshrl.u32 %v886_v38, 16 }
 0x543   :  { %1230 = vpow2.f32 %v1142_v44 }
 0x544   :  { %v888_v45 = vxor.u32 %v887_v43, %v886_v38 }
 0x545   :  { %v744_v51 = vpop.f32.mrf.mxu0  ;;  %v757_v52 = vpop.f32.mrf.mxu1 }
 0x546   :  { %v889_v49 = vshrl.u32 %v888_v45, 9 }
 0x548   :  { %v1229_v57 = vpop.eup %1228  ;;  %v890_v53 = vor.u32 1065353216, %v889_v49 }
 0x549   :  { %v1231_v59 = vpop.eup %1230  ;;  %v765_v60 = vadd.f32 1.0, %v1229_v57 }
 0x54a   :  { %v766_v3 = vadd.f32 1.0, %v1231_v59  ;;  %v1152_v54 = vadd.f32 -1.0, %v890_v53 }
 0x54b   :  { %1232 = vrcp.f32 %v765_v60  ;;  %v778_v40 = vand.u32 2147483648, %v765_v60  ;;  %v776_v47 = vand.u32 2147483647, %v765_v60  ;;  %vm772_vm14 = vweird.f32 %v765_v60 }
 0x54c   :  { %1234 = vrcp.f32 %v766_v3  ;;  %v793_v56 = vand.u32 2147483648, %v766_v3  ;;  %v791_v1 = vand.u32 2147483647, %v766_v3  ;;  %vm787_vm0 = vweird.f32 %v766_v3 }
 0x54d   :  { %v779_v6 = vor.u32 1.1754944e-38, %v778_v40  ;;  %vm777_vm1 = vcmp.eq.f32.partialorder %v776_v47, 8.507059e+37 }
 0x54e   :  { %v794_v9 = vor.u32 1.1754944e-38, %v793_v56  ;;  %vm792_vm3 = vcmp.eq.f32.partialorder %v791_v1, 8.507059e+37 }
 0x551   :  { %v1233_v16 = vpop.eup %1232 }
 0x552   :  { %v1235_v22 = vpop.eup %1234  ;;  %v768_v23 = vmul.f32 %v1233_v16, %v765_v60  ;;  %vm773_vm12 = vweird.f32 %v1233_v16 }
 0x553   :  { %v783_v28 = vmul.f32 %v1235_v22, %v766_v3  ;;  %vm788_vm13 = vweird.f32 %v1235_v22  ;;  %vm774_vm15 = vmor %vm772_vm14, %vm773_vm12 }
 0x554   :  { %v769_v29 = vsub.f32 1.0, %v768_v23  ;;  %vm789_vm2 = vmor %vm787_vm0, %vm788_vm13  ;;  %v966_v23 = vshrl.u32 %v964_v17, 16 }
 0x555   :  { %v784_v35 = vsub.f32 1.0, %v783_v28 }
 0x556   :  { %v770_v46 = vmul.f32 %v1233_v16, %v769_v29  ;;  %v968_v29 = vxor.u32 %v966_v23, %v964_v17 }
 0x557   :  { %v785_v0 = vmul.f32 %v1235_v22, %v784_v35 }
 0x558   :  { %v771_v2 = vadd.f32 %v1233_v16, %v770_v46  ;;  %v970_v35 = vmul.u32 2146121005, %v968_v29 }
 0x559   :  { %v786_v7 = vadd.f32 %v1235_v22, %v785_v0 }
 0x55a   :  { %v775_v8 = vsel %vm774_vm15, %v1233_v16, %v771_v2  ;;  %v963_v16 = vxor.u32 %v962_v11, %v1490_v58  ;;  %v972_v47 = vshrl.u32 %v970_v35, 15 }
 0x55b   :  { %v780_v12 = vsel %vm777_vm1, %v779_v6, %v775_v8  ;;  %v790_v13 = vsel %vm789_vm2, %v1235_v22, %v786_v7 }
 0x55c   :  { %vm825_vm4 = vcmp.gt.f32.partialorder %v780_v12, %v1143_v4  ;;  %v795_v14 = vsel %vm792_vm3, %v794_v9, %v790_v13  ;;  %v965_v22 = vshrl.u32 %v963_v16, 16  ;;  %v974_v58 = vxor.u32 %v972_v47, %v970_v35 }
 0x55d   :  { %vm1147_vm5 = vmpackc.low %vm825_vm4, %vm825_vm4  ;;  %vm826_vm6 = vcmp.gt.f32.partialorder %v795_v14, %v1144_v63 }
 0x55e   :  { %1148 = vmatmul.msk.bf16.vlgmr.msra.gmra.mxu0 %vm1147_vm5, %v1331_v42  ;;  %vm1149_vm7 = vmpackc.low %vm826_vm6, %vm826_vm6  ;;  %v967_v28 = vxor.u32 %v965_v22, %v963_v16  ;;  %v976_v7 = vmul.u32 2221713035, %v974_v58 }
 0x55f   :  { %1150 = vmatmul.msk.bf16.vlgmr.msra.gmra.mxu1 %vm1149_vm7, %v1331_v42 }
 0x560   :  { %v969_v34 = vmul.u32 2146121005, %v967_v28  ;;  %v978_v13 = vshrl.u32 %v976_v7, 16 }
 0x562   :  { %v971_v40 = vshrl.u32 %v969_v34, 15 }
 0x564   :  { %v973_v2 = vxor.u32 %v971_v40, %v969_v34 }
 0x566   :  { %v975_v48 = vmul.u32 2221713035, %v973_v2 }
 0x568   :  { %v977_v8 = vshrl.u32 %v975_v48, 16 }
 0x5db   :  { %v842_v24 = vpop.f32.mrf.mxu0 }
 0x5dc   :  { %v843_v26 = vadd.f32 %v1248_v25, %v842_v24  ;;  %v855_v27 = vpop.f32.mrf.mxu1 }
 0x5de   :  { %v856_v31 = vadd.f32 %v855_v27, %v843_v26 }
 0x5e0   :  { %v1151_v32 = vmul.f32 -1.442695, %v856_v31 }
 0x5e2   :  { %1236 = vpow2.f32 %v1151_v32 }
 0x5e3   :  { %v844_v36 = vpop.f32.mrf.mxu0 }
 0x5e4   :  { %v857_v37 = vpop.f32.mrf.mxu1 }
 0x5e8   :  { %v1237_v39 = vpop.eup %1236 }
 0x5e9   :  { %v862_v44 = vadd.f32 1.0, %v1237_v39 }
 0x5eb   :  { %1238 = vrcp.f32 %v862_v44  ;;  %v874_v57 = vand.u32 2147483648, %v862_v44  ;;  %v872_v59 = vand.u32 2147483647, %v862_v44  ;;  %vm868_vm9 = vweird.f32 %v862_v44 }
 0x5ed   :  { %v875_v3 = vor.u32 1.1754944e-38, %v874_v57  ;;  %vm873_vm11 = vcmp.eq.f32.partialorder %v872_v59, 8.507059e+37 }
 0x5f1   :  { %v1239_v50 = vpop.eup %1238 }
 0x5f2   :  { %v864_v51 = vmul.f32 %v1239_v50, %v862_v44  ;;  %vm869_vm8 = vweird.f32 %v1239_v50 }
 0x5f3   :  { %vm870_vm10 = vmor %vm868_vm9, %vm869_vm8 }
 0x5f4   :  { %v865_v52 = vsub.f32 1.0, %v864_v51 }
 0x5f6   :  { %v866_v55 = vmul.f32 %v1239_v50, %v865_v52 }
 0x5f8   :  { %v867_v60 = vadd.f32 %v1239_v50, %v866_v55  ;;  %v1333_v55 = vmov 0.0  }
 0x5fa   :  { %v871_v5 = vsel %vm870_vm10, %v1239_v50, %v867_v60 }
 0x5fb   :  { %v876_v10 = vsel %vm873_vm11, %v875_v3, %v871_v5 }
 0x5fc   :  { %vm893_vm12 = vcmp.gt.f32.partialorder %v876_v10, %v1152_v54 }
 0x5fd   :  { %vm1154_vm13 = vmpackc.low %vm893_vm12, %vm893_vm12 }
 0x5fe   :  { %1155 = vmatmul.msk.bf16.vlgmr.msra.gmra.mxu2 %vm1154_vm13, %v1331_v42  ;;  %1157 = vmatmul.msk.bf16.vlgmr.msra.gmra.mxu3 %vm1154_vm13, %v1331_v42 }
 0x681   :  { %v906_v41 = vpop.f32.mrf.mxu2  ;;  %v919_v46 = vpop.f32.mrf.mxu3 }
 0x682   :  { %v907_v42 = vadd.f32 %v906_v41, %v1533_v61  ;;  %v920_v56 = vadd.f32 %v919_v46, %v1535_v62  ;;  %v979_v61 = vxor.u32 %v977_v8, %v975_v48  ;;  %v980_v62 = vxor.u32 %v978_v13, %v976_v7 }
 0x684   :  { %v1158_v0 = vmul.f32 -1.442695, %v907_v42  ;;  %v1159_v1 = vmul.f32 -1.442695, %v920_v56  ;;  %v981_v15 = vshrl.u32 %v979_v61, 9  ;;  %v982_v19 = vshrl.u32 %v980_v62, 9 }
 0x686   :  { %1240 = vpow2.f32 %v1158_v0  ;;  %v983_v26 = vor.u32 1065353216, %v981_v15  ;;  %v984_v31 = vor.u32 1065353216, %v982_v19 }
 0x687   :  { %1242 = vpow2.f32 %v1159_v1 }
 0x688   :  { %v1160_v43 = vadd.f32 -1.0, %v983_v26  ;;  %v1161_v49 = vadd.f32 -1.0, %v984_v31 }
 0x689   :  { %v908_v4 = vpop.f32.mrf.mxu2  ;;  %v921_v6 = vpop.f32.mrf.mxu3 }
 0x68c   :  { %v1241_v63 = vpop.eup %1240 }
 0x68d   :  { %v1243_v9 = vpop.eup %1242  ;;  %v929_v12 = vadd.f32 1.0, %v1241_v63 }
 0x68e   :  { %v930_v14 = vadd.f32 1.0, %v1243_v9 }
 0x68f   :  { %1244 = vrcp.f32 %v929_v12  ;;  %v942_v30 = vand.u32 2147483648, %v929_v12  ;;  %v940_v33 = vand.u32 2147483647, %v929_v12  ;;  %vm936_vm0 = vweird.f32 %v929_v12 }
 0x690   :  { %1246 = vrcp.f32 %v930_v14  ;;  %v957_v36 = vand.u32 2147483648, %v930_v14  ;;  %v955_v38 = vand.u32 2147483647, %v930_v14  ;;  %vm951_vm2 = vweird.f32 %v930_v14 }
 0x691   :  { %v943_v44 = vor.u32 1.1754944e-38, %v942_v30  ;;  %vm941_vm3 = vcmp.eq.f32.partialorder %v940_v33, 8.507059e+37 }
 0x692   :  { %v958_v51 = vor.u32 1.1754944e-38, %v957_v36  ;;  %vm956_vm5 = vcmp.eq.f32.partialorder %v955_v38, 8.507059e+37 }
 0x695   :  { %v1245_v18 = vpop.eup %1244 }
 0x696   :  { %v1247_v20 = vpop.eup %1246  ;;  %v932_v21 = vmul.f32 %v1245_v18, %v929_v12  ;;  %vm937_vm14 = vweird.f32 %v1245_v18 }
 0x697   :  { %v947_v24 = vmul.f32 %v1247_v20, %v930_v14  ;;  %vm952_vm15 = vweird.f32 %v1247_v20  ;;  %vm938_vm1 = vmor %vm936_vm0, %vm937_vm14 }
 0x698   :  { %v933_v25 = vsub.f32 1.0, %v932_v21  ;;  %vm953_vm4 = vmor %vm951_vm2, %vm952_vm15 }
 0x699   :  { %v948_v27 = vsub.f32 1.0, %v947_v24 }
 0x69a   :  { %v934_v32 = vmul.f32 %v1245_v18, %v933_v25 }
 0x69b   :  { %v949_v37 = vmul.f32 %v1247_v20, %v948_v27 }
 0x69c   :  { %v935_v39 = vadd.f32 %v1245_v18, %v934_v32 }
 0x69d   :  { %v950_v45 = vadd.f32 %v1247_v20, %v949_v37 }
 0x69e   :  { %v939_v50 = vsel %vm938_vm1, %v1245_v18, %v935_v39 }
 0x69f   :  { %v944_v52 = vsel %vm941_vm3, %v943_v44, %v939_v50  ;;  %v954_v53 = vsel %vm953_vm4, %v1247_v20, %v950_v45 }
 0x6a0   :  { %v959_v57 = vsel %vm956_vm5, %v958_v51, %v954_v53  ;;  %vm989_vm6 = vcmp.gt.f32.partialorder %v944_v52, %v1160_v43 }
 0x6a1   :  { %vm990_vm7 = vcmp.gt.f32.partialorder %v959_v57, %v1161_v49  ;;  %v1162_v59 = vsel %vm989_vm6, 1.0, %v1333_v55 }
 0x6a2   :  { %v1163_v60 = vsel %vm990_vm7, 1.0, %v1333_v55  ;;  %999 = vst [vmem:[#allocation9] sm:$0xff] %v1162_v59 }
 0x6a3   :  { %1000 = vst [vmem:[#allocation9 + $0x8] sm:$0xff] %v1163_v60 }
 0x6a4   :  { %1011 = dma.vmem_to_hbm [thread:$0]  %s1007_s9, 256, %s1009_s4, [#allocation6]  }
 0x6a5   :  { %1325 = dma.done.wait [#allocation6], 256  }
 0x6a6   :  { %1326 = vsyncadd [#allocation6], 4294967040 }
 0x6a7   :  { %1016 = vsyncpa [#allocation5], 1 }
 0x6a8   :  { %1017 = vsyncpa [#allocation8], 1 }
 0x6a9   :  { %1018 = vsyncpa [#allocation6], 1 }

</bundles_post_ra>
